<compile_context>
chip_gen: v7x
topology: tpu7x:2x2x1
jax: 0.10.0
libtpu: 0.0.40
codegen_flags: <defaults>
</compile_context>

<pallas_src>
import functools

import jax
import jax.numpy as jnp
from jax import lax
from jax.experimental import pallas as pl
from jax.experimental.pallas import tpu as pltpu


def _bottleneck_kernel(x_ref, halo_ref, w1_ref, b1_ref, w2_ref, b2_ref,
                       w3_ref, b3_ref, out_ref, pad_ref, col_ref=None, *, rate):
    # x_ref   : (Hb, W, Cin)      bf16   band rows of the input (also the residual source)
    # halo_ref: (2r, W, Cin)      bf16   `rate` rows above + `rate` rows below the band
    #                                    (zeros at the image border)
    # w1      : (Cin, P)          bf16   1x1 conv, BN1 scale folded in
    # w2      : (9P, P)           bf16   3x3 conv, im2col rows ordered (ky, kx, cin), BN2 folded
    # w3      : (P, Cin)          bf16   1x1 conv, BN3 scale folded in
    # b1/b2/b3: (1,P)/(1,P)/(1,Cin) f32  folded BN biases
    # pad_ref : (Hb+2r, W+2r, P)  bf16   zero-padded conv2 input scratch
    # col_ref : (Hb+2r, W, 3P)    bf16   kx-unrolled im2col slab (only when P % 128 == 0)
    Hb, W, Cin = x_ref.shape
    P = w1_ref.shape[1]
    r = rate
    Hp, Wp = Hb + 2 * r, W + 2 * r
    band = pl.program_id(1)
    last_band = pl.num_programs(1) - 1

    # ---- conv1 (1x1) + bn1-bias + relu : bf16 MXU operands, f32 accumulate ----
    o1 = jnp.dot(x_ref[...].reshape(Hb * W, Cin), w1_ref[...],
                 preferred_element_type=jnp.float32)
    o1 = jnp.maximum(o1 + b1_ref[...], 0.0)                                  # (Hb*W, P) f32
    # Halo rows are recomputed per band (2*rate rows only -> cheap).
    o1h = jnp.dot(halo_ref[...].reshape(2 * r * W, Cin), w1_ref[...],
                  preferred_element_type=jnp.float32)
    o1h = jnp.maximum(o1h + b1_ref[...], 0.0)                                # (2r*W, P) f32

    # ---- assemble the zero-padded conv2 input (every element rewritten each step) ----
    zeros = lambda shape: jnp.zeros(shape, pad_ref.dtype)
    pad_ref[:, 0:r, :] = zeros((Hp, r, P))                                   # left border
    pad_ref[:, r + W:Wp, :] = zeros((Hp, r, P))                              # right border
    pad_ref[0:r, r:r + W, :] = o1h[0:r * W].reshape(r, W, P).astype(pad_ref.dtype)
    pad_ref[r:r + Hb, r:r + W, :] = o1.reshape(Hb, W, P).astype(pad_ref.dtype)
    pad_ref[r + Hb:Hp, r:r + W, :] = o1h[r * W:2 * r * W].reshape(r, W, P).astype(pad_ref.dtype)

    # Image-border halo rows must be zeros (conv2 zero padding), not relu(bn1(conv1(0))).
    @pl.when(band == 0)
    def _():
        pad_ref[0:r, :, :] = zeros((r, Wp, P))

    @pl.when(band == last_band)
    def _():
        pad_ref[r + Hb:Hp, :, :] = zeros((r, Wp, P))

    # ---- conv2 (3x3, stride 1, padding=rate, dilation=rate) + bn2-bias + relu ----
    o2 = None
    if col_ref is not None:
        # Fast path (P % 128 == 0): 3 lane-aligned slab writes (one per kx sublane shift),
        # then 3 accumulated (Hb*W, 3P) x (3P, P) matmuls; the ky slice along the leading
        # dim is free and the w2 row block [ky*3P:(ky+1)*3P] is contiguous.
        for kx in range(3):
            col_ref[:, :, kx * P:(kx + 1) * P] = pad_ref[:, kx * r:kx * r + W, :]
        for ky in range(3):
            blk = col_ref[ky * r:ky * r + Hb].reshape(Hb * W, 3 * P)
            part = jnp.dot(blk, w2_ref[ky * 3 * P:(ky + 1) * 3 * P, :],
                           preferred_element_type=jnp.float32)
            o2 = part if o2 is None else o2 + part
    else:
        # Small-P path: skip the slab (its lane-offset writes would all be masked stores)
        # and do 9 accumulating matmuls straight off the pad scratch.
        for kx in range(3):
            shifted = pad_ref[:, kx * r:kx * r + W, :]                       # (Hp, W, P) bf16
            for ky in range(3):
                tap = shifted[ky * r:ky * r + Hb].reshape(Hb * W, P)
                t = ky * 3 + kx                                              # matches w2 rows
                part = jnp.dot(tap, w2_ref[t * P:(t + 1) * P, :],
                               preferred_element_type=jnp.float32)
                o2 = part if o2 is None else o2 + part
    o2 = jnp.maximum(o2 + b2_ref[...], 0.0)                                  # (Hb*W, P) f32

    # ---- conv3 (1x1) + bn3-bias + residual add + relu ----
    o3 = jnp.dot(o2.astype(jnp.bfloat16), w3_ref[...],
                 preferred_element_type=jnp.float32) + b3_ref[...]
    res = x_ref[...].astype(jnp.float32).reshape(Hb * W, Cin)   # re-read: short live range
    o3 = jnp.maximum(o3 + res, 0.0)
    out_ref[...] = o3.reshape(Hb, W, Cin).astype(out_ref.dtype)


def _folded_weights(params):
    # Fold eval-mode BN scale into the conv weights in f32, then cast to bf16 for the MXU.
    P = params["w1"].shape[1]
    w1 = (params["w1"] * params["s1"]).astype(jnp.bfloat16)                        # (Cin, P)
    w2 = (params["w2"] * params["s2"].reshape(1, 1, 1, P)).astype(jnp.bfloat16)    # (3,3,P,P)
    w3 = (params["w3"] * params["s3"]).astype(jnp.bfloat16)                        # (P, Cin)
    return w1, w2, w3


def _vmem_limit_bytes():
    # ~85% of physical VMEM, capped: ~108 MiB on v5e/v6e (128 MiB), ~54 MiB on v7x (64 MiB).
    try:
        cap = int(getattr(pltpu.get_tpu_info(), "vmem_capacity_bytes", 64 * 1024 * 1024))
    except Exception:
        cap = 64 * 1024 * 1024
    return max(32 * 1024 * 1024, min(int(cap * 0.85), 112 * 1024 * 1024))


def bottleneck_pallas(x_nhwc, params, *, rate=1, band_rows=None):
    N, H, W, Cin = x_nhwc.shape
    P = params["w1"].shape[1]
    # Residual path requires inplanes == planes * expansion (stride=1, downsample=None).
    assert Cin == 4 * P, "inplanes must equal planes * expansion for the identity residual"
    assert W % 8 == 0, "W must be a multiple of 8 (free (Hb*W, C) reshapes)"
    if band_rows is None:
        band_rows = H
    assert H % band_rows == 0, "H must be divisible by band_rows"
    assert rate <= band_rows, "halo must fit inside a single neighbouring band"
    Hb, B = band_rows, H // band_rows
    # Perf note: Cin should be a multiple of 128 so input/residual/output stores are
    # lane-dense, and P a multiple of 128 for the lane-aligned im2col fast path.

    w1, w2_hwio, w3 = _folded_weights(params)
    w2 = w2_hwio.reshape(9 * P, P)                       # im2col rows ordered (ky, kx, cin)
    b1, b2, b3 = params["b1"], params["b2"], params["b3"]

    x = x_nhwc.astype(jnp.bfloat16)
    # Row-band halo: `rate` rows above and below each band, zeros at the image border.
    xp = jnp.pad(x, ((0, 0), (rate, rate), (0, 0), (0, 0)))
    tops = jnp.stack([xp[:, b * Hb:b * Hb + rate] for b in range(B)], axis=1)
    bots = jnp.stack([xp[:, b * Hb + Hb + rate:b * Hb + Hb + 2 * rate] for b in range(B)],
                     axis=1)
    x_halo = jnp.concatenate([tops, bots], axis=2).reshape(N * B, 2 * rate, W, Cin)

    use_col = (P % 128 == 0)
    scratch = [pltpu.VMEM((Hb + 2 * rate, W + 2 * rate, P), jnp.bfloat16)]   # padded conv2 in
    if use_col:
        scratch.append(pltpu.VMEM((Hb + 2 * rate, W, 3 * P), jnp.bfloat16))  # kx im2col slab

    def _rep(arr):
        nd = arr.ndim
        return pl.BlockSpec(arr.shape, lambda n, b, _nd=nd: (0,) * _nd)

    flops = 2 * N * H * W * (Cin * P + 9 * P * P + P * Cin)
    bytes_accessed = (2 * N * H * W * Cin * 2                      # bf16 x in + bf16 out
                      + x_halo.size * 2
                      + (w1.size + w2.size + w3.size) * 2
                      + (b1.size + b2.size + b3.size) * 4)

    kernel = functools.partial(_bottleneck_kernel, rate=rate)
    return pl.pallas_call(
        kernel,
        out_shape=jax.ShapeDtypeStruct((N, H, W, Cin), jnp.bfloat16),
        grid_spec=pltpu.PrefetchScalarGridSpec(
            num_scalar_prefetch=0,
            grid=(N, B),
            in_specs=[
                pl.BlockSpec((None, Hb, W, Cin), lambda n, b: (n, b, 0, 0)),
                pl.BlockSpec((None, 2 * rate, W, Cin),
                             lambda n, b, _B=B: (n * _B + b, 0, 0, 0)),
                _rep(w1), _rep(b1), _rep(w2), _rep(b2), _rep(w3), _rep(b3),
            ],
            out_specs=pl.BlockSpec((None, Hb, W, Cin), lambda n, b: (n, b, 0, 0)),
            scratch_shapes=scratch,
        ),
        compiler_params=pltpu.CompilerParams(
            dimension_semantics=("parallel", "parallel"),
            vmem_limit_bytes=_vmem_limit_bytes(),
        ),
        cost_estimate=pl.CostEstimate(flops=flops, transcendentals=0,
                                      bytes_accessed=bytes_accessed),
    )(x, x_halo, w1, b1, w2, b2, w3, b3)


def bottleneck_nchw(x_nchw, params, *, rate=1, band_rows=None):
    # PyTorch boundary: NCHW in / NCHW (bf16) out.  Cast to bf16 before transposing so the
    # boundary transposes move half the HBM bytes.
    x_nhwc = jnp.transpose(x_nchw.astype(jnp.bfloat16), (0, 2, 3, 1))
    y_nhwc = bottleneck_pallas(x_nhwc, params, rate=rate, band_rows=band_rows)
    return jnp.transpose(y_nhwc, (0, 3, 1, 2))


def _fold_bn(gamma, beta, mean, var, eps=1e-5):
    scale = gamma / jnp.sqrt(var + eps)
    bias = beta - mean * scale
    return scale[None, :], bias[None, :]


def _reference_nhwc(x_nhwc_bf16, params, rate):
    # Pure-JAX reference using the same folded bf16 weights / f32-accumulate math path.
    w1, w2, w3 = _folded_weights(params)
    b1, b2, b3 = params["b1"][0], params["b2"][0], params["b3"][0]
    dn = ("NHWC", "HWIO", "NHWC")

    def conv(inp, w, padding, rhs_dilation=None):
        return lax.conv_general_dilated(
            inp.astype(jnp.bfloat16), w, (1, 1), padding,
            rhs_dilation=rhs_dilation, dimension_numbers=dn,
            preferred_element_type=jnp.float32)

    x = x_nhwc_bf16
    o = jnp.maximum(conv(x, w1[None, None], "VALID") + b1, 0.0)
    o = jnp.maximum(conv(o, w2, [(rate, rate), (rate, rate)], (rate, rate)) + b2, 0.0)
    o = conv(o, w3[None, None], "VALID") + b3
    return jnp.maximum(o + x.astype(jnp.float32), 0.0)


def _make_params(key, planes, inplanes):
    ks = jax.random.split(key, 15)
    params = {
        "w1": 0.1 * jax.random.normal(ks[0], (inplanes, planes), jnp.float32),
        "w2": 0.1 * jax.random.normal(ks[1], (3, 3, planes, planes), jnp.float32),
        "w3": 0.1 * jax.random.normal(ks[2], (planes, inplanes), jnp.float32),
    }
    params["s1"], params["b1"] = _fold_bn(
        1.0 + 0.1 * jax.random.normal(ks[3], (planes,)),
        0.1 * jax.random.normal(ks[4], (planes,)),
        0.1 * jax.random.normal(ks[5], (planes,)),
        jnp.abs(jax.random.normal(ks[6], (planes,))) + 0.5)
    params["s2"], params["b2"] = _fold_bn(
        1.0 + 0.1 * jax.random.normal(ks[7], (planes,)),
        0.1 * jax.random.normal(ks[8], (planes,)),
        0.1 * jax.random.normal(ks[9], (planes,)),
        jnp.abs(jax.random.normal(ks[10], (planes,))) + 0.5)
    params["s3"], params["b3"] = _fold_bn(
        1.0 + 0.1 * jax.random.normal(ks[11], (inplanes,)),
        0.1 * jax.random.normal(ks[12], (inplanes,)),
        0.1 * jax.random.normal(ks[13], (inplanes,)),
        jnp.abs(jax.random.normal(ks[14], (inplanes,))) + 0.5)
    return params


if __name__ == "__main__":
    key = jax.random.PRNGKey(0)

    # (planes, rate, N, H, W, band_rows): exercises both conv2 paths, banding, and dilation.
    cases = [
        (32, 1, 2, 16, 16, 8),    # small-P direct-matmul path, 2 row bands per image
        (128, 2, 1, 16, 16, 8),   # lane-aligned im2col fast path, dilation 2, 2 row bands
    ]
    for i, (planes, rate, N, H, W, band_rows) in enumerate(cases):
        inplanes = planes * 4
        kp, kx, key = jax.random.split(key, 3)
        params = _make_params(kp, planes, inplanes)
        x_nchw = jax.random.normal(kx, (N, inplanes, H, W), jnp.float32)

        fn = jax.jit(functools.partial(bottleneck_nchw, rate=rate, band_rows=band_rows))
        y = jax.block_until_ready(fn(x_nchw, params))
        assert y.shape == (N, inplanes, H, W)

        # Pure-JAX reference check (same bf16 boundary / folded-weight math).
        x_nhwc = jnp.transpose(x_nchw, (0, 2, 3, 1)).astype(jnp.bfloat16)
        y_ref = jnp.transpose(_reference_nhwc(x_nhwc, params, rate), (0, 3, 1, 2))
        y_ref = y_ref.astype(jnp.bfloat16).astype(jnp.float32)
        y_f32 = y.astype(jnp.float32)
        max_err = float(jnp.max(jnp.abs(y_f32 - y_ref)))
        assert jnp.allclose(y_f32, y_ref, atol=2e-2, rtol=2e-2), (
            f"case {i}: mismatch vs reference (max |err| = {max_err})")

    print("KERNEL_OK")
</pallas_src>

<mosaic_0001>
module attributes {stable_mosaic.version = 11 : i64} {
  func.func @_bottleneck_kernel(%arg0: i32, %arg1: i32, %arg2: memref<1x8x16x128xbf16, #tpu.memory_space<vmem>>, %arg3: memref<1x2x16x128xbf16, #tpu.memory_space<vmem>>, %arg4: memref<128x32xbf16, #tpu.memory_space<vmem>>, %arg5: memref<1x32xf32, #tpu.memory_space<vmem>>, %arg6: memref<288x32xbf16, #tpu.memory_space<vmem>>, %arg7: memref<1x32xf32, #tpu.memory_space<vmem>>, %arg8: memref<32x128xbf16, #tpu.memory_space<vmem>>, %arg9: memref<1x128xf32, #tpu.memory_space<vmem>>, %arg10: memref<1x8x16x128xbf16, #tpu.memory_space<vmem>>, %arg11: memref<10x18x32xbf16, #tpu.memory_space<vmem>>) attributes {dimension_semantics = [#tpu.dimension_semantics<parallel>, #tpu.dimension_semantics<parallel>], iteration_bounds = array<i64: 2, 2>, scalar_prefetch = 0 : i64, scratch_operands = 1 : i64, tpu.core_type = #tpu.core_type<tc>, window_params = [{transform_indices = @transform_0, window_bounds = array<i64: 1, 8, 16, 128>}, {transform_indices = @transform_1, window_bounds = array<i64: 1, 2, 16, 128>}, {pipeline_mode = #tpu.pipeline_mode<synchronous>, transform_indices = @transform_2, window_bounds = array<i64: 128, 32>}, {pipeline_mode = #tpu.pipeline_mode<synchronous>, transform_indices = @transform_3, window_bounds = array<i64: 1, 32>}, {pipeline_mode = #tpu.pipeline_mode<synchronous>, transform_indices = @transform_4, window_bounds = array<i64: 288, 32>}, {pipeline_mode = #tpu.pipeline_mode<synchronous>, transform_indices = @transform_5, window_bounds = array<i64: 1, 32>}, {pipeline_mode = #tpu.pipeline_mode<synchronous>, transform_indices = @transform_6, window_bounds = array<i64: 32, 128>}, {pipeline_mode = #tpu.pipeline_mode<synchronous>, transform_indices = @transform_7, window_bounds = array<i64: 1, 128>}, {transform_indices = @transform_8, window_bounds = array<i64: 1, 8, 16, 128>}]} {
    %c0 = arith.constant 0 : index
    %c0_0 = arith.constant 0 : index
    %c0_1 = arith.constant 0 : index
    %c0_2 = arith.constant 0 : index
    %0 = vector.load %arg2[%c0, %c0_0, %c0_1, %c0_2] : memref<1x8x16x128xbf16, #tpu.memory_space<vmem>>, vector<1x8x16x128xbf16>
    %1 = vector.shape_cast %0 : vector<1x8x16x128xbf16> to vector<8x16x128xbf16>
    %2 = vector.shape_cast %1 : vector<8x16x128xbf16> to vector<128x128xbf16>
    %c0_3 = arith.constant 0 : index
    %c0_4 = arith.constant 0 : index
    %3 = vector.load %arg4[%c0_3, %c0_4] : memref<128x32xbf16, #tpu.memory_space<vmem>>, vector<128x32xbf16>
    %cst = arith.constant dense<0.000000e+00> : vector<128x32xf32>
    %4 = tpu.matmul %2, %3, %cst {dimension_numbers = #tpu.dot_dimension_numbers<[1], [0], [0], [1], [0, 0, 1, 1], [], []>} : vector<128x128xbf16>, vector<128x32xbf16>, vector<128x32xf32> -> vector<128x32xf32>
    %c0_5 = arith.constant 0 : index
    %c0_6 = arith.constant 0 : index
    %5 = vector.load %arg5[%c0_5, %c0_6] : memref<1x32xf32, #tpu.memory_space<vmem>>, vector<1x32xf32>
    %6 = vector.broadcast %5 : vector<1x32xf32> to vector<128x32xf32>
    %7 = arith.addf %4, %6 : vector<128x32xf32>
    %cst_7 = arith.constant 0.000000e+00 : f32
    %8 = vector.broadcast %cst_7 : f32 to vector<128x32xf32>
    %9 = arith.maximumf %7, %8 : vector<128x32xf32>
    %c0_8 = arith.constant 0 : index
    %c0_9 = arith.constant 0 : index
    %c0_10 = arith.constant 0 : index
    %c0_11 = arith.constant 0 : index
    %10 = vector.load %arg3[%c0_8, %c0_9, %c0_10, %c0_11] : memref<1x2x16x128xbf16, #tpu.memory_space<vmem>>, vector<1x2x16x128xbf16>
    %11 = vector.shape_cast %10 : vector<1x2x16x128xbf16> to vector<2x16x128xbf16>
    %12 = vector.shape_cast %11 : vector<2x16x128xbf16> to vector<32x128xbf16>
    %c0_12 = arith.constant 0 : index
    %c0_13 = arith.constant 0 : index
    %13 = vector.load %arg4[%c0_12, %c0_13] : memref<128x32xbf16, #tpu.memory_space<vmem>>, vector<128x32xbf16>
    %cst_14 = arith.constant dense<0.000000e+00> : vector<32x32xf32>
    %14 = tpu.matmul %12, %13, %cst_14 {dimension_numbers = #tpu.dot_dimension_numbers<[1], [0], [0], [1], [0, 0, 1, 1], [], []>} : vector<32x128xbf16>, vector<128x32xbf16>, vector<32x32xf32> -> vector<32x32xf32>
    %c0_15 = arith.constant 0 : index
    %c0_16 = arith.constant 0 : index
    %15 = vector.load %arg5[%c0_15, %c0_16] : memref<1x32xf32, #tpu.memory_space<vmem>>, vector<1x32xf32>
    %16 = vector.broadcast %15 : vector<1x32xf32> to vector<32x32xf32>
    %17 = arith.addf %14, %16 : vector<32x32xf32>
    %cst_17 = arith.constant 0.000000e+00 : f32
    %18 = vector.broadcast %cst_17 : f32 to vector<32x32xf32>
    %19 = arith.maximumf %17, %18 : vector<32x32xf32>
    %cst_18 = arith.constant 0.000000e+00 : bf16
    %20 = vector.broadcast %cst_18 : bf16 to vector<10x1x32xbf16>
    %c0_19 = arith.constant 0 : index
    %c0_20 = arith.constant 0 : index
    %c0_21 = arith.constant 0 : index
    %21 = vector.load %arg11[%c0_19, %c0_20, %c0_21] : memref<10x18x32xbf16, #tpu.memory_space<vmem>>, vector<10x1x32xbf16>
    tpu.vector_store %arg11[%c0_19, %c0_20, %c0_21], %20 {strides = array<i32>} : memref<10x18x32xbf16, #tpu.memory_space<vmem>>, vector<10x1x32xbf16>,
    %cst_22 = arith.constant 0.000000e+00 : bf16
    %22 = vector.broadcast %cst_22 : bf16 to vector<10x1x32xbf16>
    %c0_23 = arith.constant 0 : index
    %c17 = arith.constant 17 : index
    %c0_24 = arith.constant 0 : index
    %23 = vector.load %arg11[%c0_23, %c17, %c0_24] : memref<10x18x32xbf16, #tpu.memory_space<vmem>>, vector<10x1x32xbf16>
    tpu.vector_store %arg11[%c0_23, %c17, %c0_24], %22 {strides = array<i32>} : memref<10x18x32xbf16, #tpu.memory_space<vmem>>, vector<10x1x32xbf16>,
    %24 = vector.extract_strided_slice %19 {offsets = [0, 0], sizes = [16, 32], strides = [1, 1]} : vector<32x32xf32> to vector<16x32xf32>
    %25 = vector.shape_cast %24 : vector<16x32xf32> to vector<1x16x32xf32>
    %26 = arith.truncf %25 : vector<1x16x32xf32> to vector<1x16x32xbf16>
    %c0_25 = arith.constant 0 : index
    %c1 = arith.constant 1 : index
    %c0_26 = arith.constant 0 : index
    %27 = vector.load %arg11[%c0_25, %c1, %c0_26] : memref<10x18x32xbf16, #tpu.memory_space<vmem>>, vector<1x16x32xbf16>
    tpu.vector_store %arg11[%c0_25, %c1, %c0_26], %26 {strides = array<i32>} : memref<10x18x32xbf16, #tpu.memory_space<vmem>>, vector<1x16x32xbf16>,
    %28 = vector.shape_cast %9 : vector<128x32xf32> to vector<8x16x32xf32>
    %29 = arith.truncf %28 : vector<8x16x32xf32> to vector<8x16x32xbf16>
    %c1_27 = arith.constant 1 : index
    %c1_28 = arith.constant 1 : index
    %c0_29 = arith.constant 0 : index
    %30 = vector.load %arg11[%c1_27, %c1_28, %c0_29] : memref<10x18x32xbf16, #tpu.memory_space<vmem>>, vector<8x16x32xbf16>
    tpu.vector_store %arg11[%c1_27, %c1_28, %c0_29], %29 {strides = array<i32>} : memref<10x18x32xbf16, #tpu.memory_space<vmem>>, vector<8x16x32xbf16>,
    %31 = vector.extract_strided_slice %19 {offsets = [16, 0], sizes = [16, 32], strides = [1, 1]} : vector<32x32xf32> to vector<16x32xf32>
    %32 = vector.shape_cast %31 : vector<16x32xf32> to vector<1x16x32xf32>
    %33 = arith.truncf %32 : vector<1x16x32xf32> to vector<1x16x32xbf16>
    %c9 = arith.constant 9 : index
    %c1_30 = arith.constant 1 : index
    %c0_31 = arith.constant 0 : index
    %34 = vector.load %arg11[%c9, %c1_30, %c0_31] : memref<10x18x32xbf16, #tpu.memory_space<vmem>>, vector<1x16x32xbf16>
    tpu.vector_store %arg11[%c9, %c1_30, %c0_31], %33 {strides = array<i32>} : memref<10x18x32xbf16, #tpu.memory_space<vmem>>, vector<1x16x32xbf16>,
    %c0_i32 = arith.constant 0 : i32
    %35 = arith.cmpi eq, %arg1, %c0_i32 : i32
    %36 = arith.extui %35 : i1 to i32
    %c0_i32_32 = arith.constant 0 : i32
    %37 = arith.cmpi ne, %36, %c0_i32_32 : i32
    scf.if %37 {
      %cst_78 = arith.constant 0.000000e+00 : bf16
      %111 = vector.broadcast %cst_78 : bf16 to vector<1x18x32xbf16>
      %c0_79 = arith.constant 0 : index
      %c0_80 = arith.constant 0 : index
      %c0_81 = arith.constant 0 : index
      %112 = vector.load %arg11[%c0_79, %c0_80, %c0_81] : memref<10x18x32xbf16, #tpu.memory_space<vmem>>, vector<1x18x32xbf16>
      tpu.vector_store %arg11[%c0_79, %c0_80, %c0_81], %111 {strides = array<i32>} : memref<10x18x32xbf16, #tpu.memory_space<vmem>>, vector<1x18x32xbf16>,
    } else {
    }
    %c1_i32 = arith.constant 1 : i32
    %38 = arith.cmpi eq, %arg1, %c1_i32 : i32
    %39 = arith.extui %38 : i1 to i32
    %c0_i32_33 = arith.constant 0 : i32
    %40 = arith.cmpi ne, %39, %c0_i32_33 : i32
    scf.if %40 {
      %cst_78 = arith.constant 0.000000e+00 : bf16
      %111 = vector.broadcast %cst_78 : bf16 to vector<1x18x32xbf16>
      %c9_79 = arith.constant 9 : index
      %c0_80 = arith.constant 0 : index
      %c0_81 = arith.constant 0 : index
      %112 = vector.load %arg11[%c9_79, %c0_80, %c0_81] : memref<10x18x32xbf16, #tpu.memory_space<vmem>>, vector<1x18x32xbf16>
      tpu.vector_store %arg11[%c9_79, %c0_80, %c0_81], %111 {strides = array<i32>} : memref<10x18x32xbf16, #tpu.memory_space<vmem>>, vector<1x18x32xbf16>,
    } else {
    }
    %c0_34 = arith.constant 0 : index
    %c0_35 = arith.constant 0 : index
    %c0_36 = arith.constant 0 : index
    %41 = vector.load %arg11[%c0_34, %c0_35, %c0_36] : memref<10x18x32xbf16, #tpu.memory_space<vmem>>, vector<10x16x32xbf16>
    %42 = vector.extract_strided_slice %41 {offsets = [0, 0, 0], sizes = [8, 16, 32], strides = [1, 1, 1]} : vector<10x16x32xbf16> to vector<8x16x32xbf16>
    %43 = vector.shape_cast %42 : vector<8x16x32xbf16> to vector<128x32xbf16>
    %c0_37 = arith.constant 0 : index
    %c0_38 = arith.constant 0 : index
    %44 = vector.load %arg6[%c0_37, %c0_38] : memref<288x32xbf16, #tpu.memory_space<vmem>>, vector<32x32xbf16>
    %cst_39 = arith.constant dense<0.000000e+00> : vector<128x32xf32>
    %45 = tpu.matmul %43, %44, %cst_39 {dimension_numbers = #tpu.dot_dimension_numbers<[1], [0], [0], [1], [0, 0, 1, 1], [], []>} : vector<128x32xbf16>, vector<32x32xbf16>, vector<128x32xf32> -> vector<128x32xf32>
    %46 = vector.extract_strided_slice %41 {offsets = [1, 0, 0], sizes = [8, 16, 32], strides = [1, 1, 1]} : vector<10x16x32xbf16> to vector<8x16x32xbf16>
    %47 = vector.shape_cast %46 : vector<8x16x32xbf16> to vector<128x32xbf16>
    %c96 = arith.constant 96 : index
    %c0_40 = arith.constant 0 : index
    %48 = vector.load %arg6[%c96, %c0_40] : memref<288x32xbf16, #tpu.memory_space<vmem>>, vector<32x32xbf16>
    %cst_41 = arith.constant dense<0.000000e+00> : vector<128x32xf32>
    %49 = tpu.matmul %47, %48, %cst_41 {dimension_numbers = #tpu.dot_dimension_numbers<[1], [0], [0], [1], [0, 0, 1, 1], [], []>} : vector<128x32xbf16>, vector<32x32xbf16>, vector<128x32xf32> -> vector<128x32xf32>
    %50 = arith.addf %45, %49 : vector<128x32xf32>
    %51 = vector.extract_strided_slice %41 {offsets = [2, 0, 0], sizes = [8, 16, 32], strides = [1, 1, 1]} : vector<10x16x32xbf16> to vector<8x16x32xbf16>
    %52 = vector.shape_cast %51 : vector<8x16x32xbf16> to vector<128x32xbf16>
    %c192 = arith.constant 192 : index
    %c0_42 = arith.constant 0 : index
    %53 = vector.load %arg6[%c192, %c0_42] : memref<288x32xbf16, #tpu.memory_space<vmem>>, vector<32x32xbf16>
    %cst_43 = arith.constant dense<0.000000e+00> : vector<128x32xf32>
    %54 = tpu.matmul %52, %53, %cst_43 {dimension_numbers = #tpu.dot_dimension_numbers<[1], [0], [0], [1], [0, 0, 1, 1], [], []>} : vector<128x32xbf16>, vector<32x32xbf16>, vector<128x32xf32> -> vector<128x32xf32>
    %55 = arith.addf %50, %54 : vector<128x32xf32>
    %c0_44 = arith.constant 0 : index
    %c1_45 = arith.constant 1 : index
    %c0_46 = arith.constant 0 : index
    %56 = vector.load %arg11[%c0_44, %c1_45, %c0_46] : memref<10x18x32xbf16, #tpu.memory_space<vmem>>, vector<10x16x32xbf16>
    %57 = vector.extract_strided_slice %56 {offsets = [0, 0, 0], sizes = [8, 16, 32], strides = [1, 1, 1]} : vector<10x16x32xbf16> to vector<8x16x32xbf16>
    %58 = vector.shape_cast %57 : vector<8x16x32xbf16> to vector<128x32xbf16>
    %c32 = arith.constant 32 : index
    %c0_47 = arith.constant 0 : index
    %59 = vector.load %arg6[%c32, %c0_47] : memref<288x32xbf16, #tpu.memory_space<vmem>>, vector<32x32xbf16>
    %cst_48 = arith.constant dense<0.000000e+00> : vector<128x32xf32>
    %60 = tpu.matmul %58, %59, %cst_48 {dimension_numbers = #tpu.dot_dimension_numbers<[1], [0], [0], [1], [0, 0, 1, 1], [], []>} : vector<128x32xbf16>, vector<32x32xbf16>, vector<128x32xf32> -> vector<128x32xf32>
    %61 = arith.addf %55, %60 : vector<128x32xf32>
    %62 = vector.extract_strided_slice %56 {offsets = [1, 0, 0], sizes = [8, 16, 32], strides = [1, 1, 1]} : vector<10x16x32xbf16> to vector<8x16x32xbf16>
    %63 = vector.shape_cast %62 : vector<8x16x32xbf16> to vector<128x32xbf16>
    %c128 = arith.constant 128 : index
    %c0_49 = arith.constant 0 : index
    %64 = vector.load %arg6[%c128, %c0_49] : memref<288x32xbf16, #tpu.memory_space<vmem>>, vector<32x32xbf16>
    %cst_50 = arith.constant dense<0.000000e+00> : vector<128x32xf32>
    %65 = tpu.matmul %63, %64, %cst_50 {dimension_numbers = #tpu.dot_dimension_numbers<[1], [0], [0], [1], [0, 0, 1, 1], [], []>} : vector<128x32xbf16>, vector<32x32xbf16>, vector<128x32xf32> -> vector<128x32xf32>
    %66 = arith.addf %61, %65 : vector<128x32xf32>
    %67 = vector.extract_strided_slice %56 {offsets = [2, 0, 0], sizes = [8, 16, 32], strides = [1, 1, 1]} : vector<10x16x32xbf16> to vector<8x16x32xbf16>
    %68 = vector.shape_cast %67 : vector<8x16x32xbf16> to vector<128x32xbf16>
    %c224 = arith.constant 224 : index
    %c0_51 = arith.constant 0 : index
    %69 = vector.load %arg6[%c224, %c0_51] : memref<288x32xbf16, #tpu.memory_space<vmem>>, vector<32x32xbf16>
    %cst_52 = arith.constant dense<0.000000e+00> : vector<128x32xf32>
    %70 = tpu.matmul %68, %69, %cst_52 {dimension_numbers = #tpu.dot_dimension_numbers<[1], [0], [0], [1], [0, 0, 1, 1], [], []>} : vector<128x32xbf16>, vector<32x32xbf16>, vector<128x32xf32> -> vector<128x32xf32>
    %71 = arith.addf %66, %70 : vector<128x32xf32>
    %c0_53 = arith.constant 0 : index
    %c2 = arith.constant 2 : index
    %c0_54 = arith.constant 0 : index
    %72 = vector.load %arg11[%c0_53, %c2, %c0_54] : memref<10x18x32xbf16, #tpu.memory_space<vmem>>, vector<10x16x32xbf16>
    %73 = vector.extract_strided_slice %72 {offsets = [0, 0, 0], sizes = [8, 16, 32], strides = [1, 1, 1]} : vector<10x16x32xbf16> to vector<8x16x32xbf16>
    %74 = vector.shape_cast %73 : vector<8x16x32xbf16> to vector<128x32xbf16>
    %c64 = arith.constant 64 : index
    %c0_55 = arith.constant 0 : index
    %75 = vector.load %arg6[%c64, %c0_55] : memref<288x32xbf16, #tpu.memory_space<vmem>>, vector<32x32xbf16>
    %cst_56 = arith.constant dense<0.000000e+00> : vector<128x32xf32>
    %76 = tpu.matmul %74, %75, %cst_56 {dimension_numbers = #tpu.dot_dimension_numbers<[1], [0], [0], [1], [0, 0, 1, 1], [], []>} : vector<128x32xbf16>, vector<32x32xbf16>, vector<128x32xf32> -> vector<128x32xf32>
    %77 = arith.addf %71, %76 : vector<128x32xf32>
    %78 = vector.extract_strided_slice %72 {offsets = [1, 0, 0], sizes = [8, 16, 32], strides = [1, 1, 1]} : vector<10x16x32xbf16> to vector<8x16x32xbf16>
    %79 = vector.shape_cast %78 : vector<8x16x32xbf16> to vector<128x32xbf16>
    %c160 = arith.constant 160 : index
    %c0_57 = arith.constant 0 : index
    %80 = vector.load %arg6[%c160, %c0_57] : memref<288x32xbf16, #tpu.memory_space<vmem>>, vector<32x32xbf16>
    %cst_58 = arith.constant dense<0.000000e+00> : vector<128x32xf32>
    %81 = tpu.matmul %79, %80, %cst_58 {dimension_numbers = #tpu.dot_dimension_numbers<[1], [0], [0], [1], [0, 0, 1, 1], [], []>} : vector<128x32xbf16>, vector<32x32xbf16>, vector<128x32xf32> -> vector<128x32xf32>
    %82 = arith.addf %77, %81 : vector<128x32xf32>
    %83 = vector.extract_strided_slice %72 {offsets = [2, 0, 0], sizes = [8, 16, 32], strides = [1, 1, 1]} : vector<10x16x32xbf16> to vector<8x16x32xbf16>
    %84 = vector.shape_cast %83 : vector<8x16x32xbf16> to vector<128x32xbf16>
    %c256 = arith.constant 256 : index
    %c0_59 = arith.constant 0 : index
    %85 = vector.load %arg6[%c256, %c0_59] : memref<288x32xbf16, #tpu.memory_space<vmem>>, vector<32x32xbf16>
    %cst_60 = arith.constant dense<0.000000e+00> : vector<128x32xf32>
    %86 = tpu.matmul %84, %85, %cst_60 {dimension_numbers = #tpu.dot_dimension_numbers<[1], [0], [0], [1], [0, 0, 1, 1], [], []>} : vector<128x32xbf16>, vector<32x32xbf16>, vector<128x32xf32> -> vector<128x32xf32>
    %87 = arith.addf %82, %86 : vector<128x32xf32>
    %c0_61 = arith.constant 0 : index
    %c0_62 = arith.constant 0 : index
    %88 = vector.load %arg7[%c0_61, %c0_62] : memref<1x32xf32, #tpu.memory_space<vmem>>, vector<1x32xf32>
    %89 = vector.broadcast %88 : vector<1x32xf32> to vector<128x32xf32>
    %90 = arith.addf %87, %89 : vector<128x32xf32>
    %cst_63 = arith.constant 0.000000e+00 : f32
    %91 = vector.broadcast %cst_63 : f32 to vector<128x32xf32>
    %92 = arith.maximumf %90, %91 : vector<128x32xf32>
    %93 = arith.truncf %92 : vector<128x32xf32> to vector<128x32xbf16>
    %c0_64 = arith.constant 0 : index
    %c0_65 = arith.constant 0 : index
    %94 = vector.load %arg8[%c0_64, %c0_65] : memref<32x128xbf16, #tpu.memory_space<vmem>>, vector<32x128xbf16>
    %cst_66 = arith.constant dense<0.000000e+00> : vector<128x128xf32>
    %95 = tpu.matmul %93, %94, %cst_66 {dimension_numbers = #tpu.dot_dimension_numbers<[1], [0], [0], [1], [0, 0, 1, 1], [], []>} : vector<128x32xbf16>, vector<32x128xbf16>, vector<128x128xf32> -> vector<128x128xf32>
    %c0_67 = arith.constant 0 : index
    %c0_68 = arith.constant 0 : index
    %96 = vector.load %arg9[%c0_67, %c0_68] : memref<1x128xf32, #tpu.memory_space<vmem>>, vector<1x128xf32>
    %97 = vector.broadcast %96 : vector<1x128xf32> to vector<128x128xf32>
    %98 = arith.addf %95, %97 : vector<128x128xf32>
    %c0_69 = arith.constant 0 : index
    %c0_70 = arith.constant 0 : index
    %c0_71 = arith.constant 0 : index
    %c0_72 = arith.constant 0 : index
    %99 = vector.load %arg2[%c0_69, %c0_70, %c0_71, %c0_72] : memref<1x8x16x128xbf16, #tpu.memory_space<vmem>>, vector<1x8x16x128xbf16>
    %100 = vector.shape_cast %99 : vector<1x8x16x128xbf16> to vector<8x16x128xbf16>
    %101 = arith.extf %100 : vector<8x16x128xbf16> to vector<8x16x128xf32>
    %102 = vector.shape_cast %101 : vector<8x16x128xf32> to vector<128x128xf32>
    %103 = arith.addf %98, %102 : vector<128x128xf32>
    %cst_73 = arith.constant 0.000000e+00 : f32
    %104 = vector.broadcast %cst_73 : f32 to vector<128x128xf32>
    %105 = arith.maximumf %103, %104 : vector<128x128xf32>
    %106 = vector.shape_cast %105 : vector<128x128xf32> to vector<8x16x128xf32>
    %107 = arith.truncf %106 : vector<8x16x128xf32> to vector<8x16x128xbf16>
    %c0_74 = arith.constant 0 : index
    %c0_75 = arith.constant 0 : index
    %c0_76 = arith.constant 0 : index
    %c0_77 = arith.constant 0 : index
    %108 = vector.load %arg10[%c0_74, %c0_75, %c0_76, %c0_77] : memref<1x8x16x128xbf16, #tpu.memory_space<vmem>>, vector<1x8x16x128xbf16>
    %109 = vector.shape_cast %108 : vector<1x8x16x128xbf16> to vector<8x16x128xbf16>
    %110 = vector.shape_cast %107 : vector<8x16x128xbf16> to vector<1x8x16x128xbf16>
    tpu.vector_store %arg10[%c0_74, %c0_75, %c0_76, %c0_77], %110 {strides = array<i32>} : memref<1x8x16x128xbf16, #tpu.memory_space<vmem>>, vector<1x8x16x128xbf16>,
    return
  }
  func.func @transform_0(%arg0: i32, %arg1: i32) -> (i32, i32, i32, i32) {
    %c0_i32 = arith.constant 0 : i32
    %c0_i32_0 = arith.constant 0 : i32
    %c0_i32_1 = arith.constant 0 : i32
    return %arg0, %arg1, %c0_i32, %c0_i32_0 : i32, i32, i32, i32
  }
  func.func @transform_1(%arg0: i32, %arg1: i32) -> (i32, i32, i32, i32) {
    %c2_i32 = arith.constant 2 : i32
    %0 = arith.muli %arg0, %c2_i32 : i32
    %1 = arith.addi %0, %arg1 : i32
    %c0_i32 = arith.constant 0 : i32
    %c0_i32_0 = arith.constant 0 : i32
    %c0_i32_1 = arith.constant 0 : i32
    %c0_i32_2 = arith.constant 0 : i32
    return %1, %c0_i32, %c0_i32_0, %c0_i32_1 : i32, i32, i32, i32
  }
  func.func @transform_2(%arg0: i32, %arg1: i32) -> (i32, i32) {
    %c0_i32 = arith.constant 0 : i32
    %c0_i32_0 = arith.constant 0 : i32
    %c0_i32_1 = arith.constant 0 : i32
    return %c0_i32, %c0_i32_0 : i32, i32
  }
  func.func @transform_3(%arg0: i32, %arg1: i32) -> (i32, i32) {
    %c0_i32 = arith.constant 0 : i32
    %c0_i32_0 = arith.constant 0 : i32
    %c0_i32_1 = arith.constant 0 : i32
    return %c0_i32, %c0_i32_0 : i32, i32
  }
  func.func @transform_4(%arg0: i32, %arg1: i32) -> (i32, i32) {
    %c0_i32 = arith.constant 0 : i32
    %c0_i32_0 = arith.constant 0 : i32
    %c0_i32_1 = arith.constant 0 : i32
    return %c0_i32, %c0_i32_0 : i32, i32
  }
  func.func @transform_5(%arg0: i32, %arg1: i32) -> (i32, i32) {
    %c0_i32 = arith.constant 0 : i32
    %c0_i32_0 = arith.constant 0 : i32
    %c0_i32_1 = arith.constant 0 : i32
    return %c0_i32, %c0_i32_0 : i32, i32
  }
  func.func @transform_6(%arg0: i32, %arg1: i32) -> (i32, i32) {
    %c0_i32 = arith.constant 0 : i32
    %c0_i32_0 = arith.constant 0 : i32
    %c0_i32_1 = arith.constant 0 : i32
    return %c0_i32, %c0_i32_0 : i32, i32
  }
  func.func @transform_7(%arg0: i32, %arg1: i32) -> (i32, i32) {
    %c0_i32 = arith.constant 0 : i32
    %c0_i32_0 = arith.constant 0 : i32
    %c0_i32_1 = arith.constant 0 : i32
    return %c0_i32, %c0_i32_0 : i32, i32
  }
  func.func @transform_8(%arg0: i32, %arg1: i32) -> (i32, i32, i32, i32) {
    %c0_i32 = arith.constant 0 : i32
    %c0_i32_0 = arith.constant 0 : i32
    %c0_i32_1 = arith.constant 0 : i32
    return %arg0, %arg1, %c0_i32, %c0_i32_0 : i32, i32, i32, i32
  }
}

</mosaic_0001>

<bundles_post_ra>
// kernel: bottleneck_nchw.1
= control target key start
LH: loop header
LB: loop body
LE: loop exit
PB: predicated region body
PF: predicated region fallthrough
CT: control target
= control target key end

     0   :  { %13 = vsyncpa [#allocation4], 0  ;;  %s5320_s0 = inlined_call_operand.vmem [shape: bf16[2,16,16,128], index: 0, kind: input, shape index: {}]   ;;  %s5321_s1 = inlined_call_operand.vmem [shape: bf16[4,2,16,128], index: 1, kind: input, shape index: {}]   ;;  %s5322_s2 = inlined_call_operand.vmem [shape: bf16[128,32], index: 2, kind: input, shape index: {}]   ;;  %s5323_s3 = inlined_call_operand.vmem [shape: f32[1,32], index: 3, kind: input, shape index: {}]   ;;  %s5324_s4 = inlined_call_operand.vmem [shape: bf16[288,32], index: 4, kind: input, shape index: {}]   ;;  %s5325_s5 = inlined_call_operand.vmem [shape: f32[1,32], index: 5, kind: input, shape index: {}]   ;;  %s5326_s6 = inlined_call_operand.vmem [shape: bf16[32,128], index: 6, kind: input, shape index: {}]   ;;  %s5327_s7 = inlined_call_operand.vmem [shape: f32[1,128], index: 7, kind: input, shape index: {}]   ;;  %s5328_s8 = inlined_call_operand.hbm [shape: bf16[2,16,16,128], index: 8, kind: output, shape index: {}]  }
   0x1   :  { %15 = vsyncpa [#allocation4 + $0x1], 0  ;;  %s4413_s27 = smov 0   ;;  %s4415_s28 = smov 0  }
   0x2   :  { %s4417_s29 = smov 0   ;;  %s4419_s30 = smov 0  }
   0x3   :  { %s4421_s9 = smov 0   ;;  %s4423_s10 = smov 0  }
   0x4   :  { %s4425_s11 = smov 0   ;;  %s4427_s12 = smov 0  }
   0x5 LB: > { %5336 = sst [smem:[#allocation6_spill]] %s4341_s29  ;;  %s3293_s13 = sadd.s32 4294967295, %s4361_s12   ;;  %s4361_s12 = sphi %s4427_s12, %s21_s12   ;;  %s4357_s11 = sphi %s4425_s11, %s5364_s11   ;;  %s4353_s10 = sphi %s4423_s10, %s5363_s10   ;;  %s4349_s9 = sphi %s4421_s9, %s5362_s9   ;;  %s4345_s30 = sphi %s4419_s30, %s5361_s30   ;;  %s4341_s29 = sphi %s4417_s29, %s5360_s29   ;;  %s4337_s28 = sphi %s4415_s28, %s5366_s28   ;;  %s4333_s27 = sphi %s4413_s27, %s5365_s27  }
   0x6   : > { %5337 = sst [smem:[#allocation7_spill]] %s4353_s10  ;;  %s3294_s14 = sadd.s32 4294967294, %s4361_s12  }
   0x7   : > { %5338 = sst [smem:[#allocation8_spill]] %s4357_s11  ;;  %s30_s15 = sadd.s32 1, %s4353_s10 }
   0x8   : > { %p31_p0 = scmp.ge.s32.totalorder %s30_s15, 2  ;;  %s33_s16 = sadd.s32 1, %s4357_s11 }
   0x9   : > { %p236_p1 = scmp.ne.s32.totalorder %s4341_s29, %s4337_s28  ;;  %p237_p2 = scmp.eq.s32.totalorder %s3293_s13, 3 }
   0xa   : > { %s5368_s15 = smov (%p31_p0, %s30_s15), 0  ;;  %s5370_s16 = smov (!%p31_p0, %s33_s16), %s4357_s11 }
   0xb   : > { %5339 = sst [smem:[#allocation9_spill]] %s5368_s15  ;;  %s222_s17 = ssub.s32 %s4353_s10, %s5368_s15 }
   0xc   : > { %p4464_p3 = por %p237_p2, %p236_p1  ;;  %p35_p4 = scmp.ge.s32.totalorder %s5370_s16, 2 }
   0xd   : > { %p242_p5 = scmp.ne.s32.totalorder %s4337_s28, %s4333_s27  ;;  %p243_p6 = scmp.eq.s32.totalorder %s3294_s14, 3 }
   0xe   : > { %p3299_p7 = scmp.ge.s32.totalorder %s4361_s12, 1  ;;  %s5372_s16 = smov (%p35_p4, %s5370_s16), 0 }
   0xf   : > { %5341 = sst [smem:[#allocation10_spill]] %s5372_s16  ;;  %p4473_p8 = por %p243_p6, %p242_p5 }
  0x10   : > { %p305_p9 = scmp.lt.s32.totalorder %s4361_s12, 5  ;;  %s221_s20 = ssub.s32 %s4357_s11, %s5372_s16 }
  0x11   : > { %s5342_s19 = scalar_select %p4473_p8, 1, 0 }
  0x12   : > { %s226_s21 = sadd.s32 1, %s4341_s29  ;;  %s223_s22 = sor.u32 %s222_s17, %s221_s20 }
  0x13   : > { %5343 = sst [smem:[#allocation11_spill]] %s5342_s19  ;;  %p306_p10 = pnand %p3299_p7, %p305_p9 }
  0x14   : > { %p224_p11 = scmp.eq.s32.totalorder %s223_s22, 0  ;;  %s5329_s24 = sand.u32 (!%p306_p10), 1, %s4337_s28   ;;  %v4219_v0 = vld [vmem:[%s5322_s2] sm:$0xff] (!%p306_p10)   ;;  %v4220_v1 = vld [vmem:[%s5322_s2 + $0x8] sm:$0xff] (!%p306_p10)   ;;  %v4221_v2 = vld [vmem:[%s5322_s2 + $0x10] sm:$0xff] (!%p306_p10)   ;;  %vm690_vm0 = vcmask (!%p306_p10), 253952  }
  0x15   : > { %309 = sbr.rel (%p306_p10) target bundleno = 1000 (0x3e8), region = 52  ;;  %s4490_s13 = sshll.u32 (!%p306_p10), %s5329_s24, 6  ;;  %3764 = vmatprep.subr.bf16.mxu0 (!%p306_p10), %v4219_v0  ;;  %v4222_v3 = vld [vmem:[%s5322_s2 + $0x18] sm:$0xff] (!%p306_p10)   ;;  %v4223_v4 = vld [vmem:[%s5322_s2 + $0x20] sm:$0xff] (!%p306_p10)   ;;  %v4224_v6 = vld [vmem:[%s5322_s2 + $0x28] sm:$0xff] (!%p306_p10)   ;;  %vm783_vm5 = vcmask (!%p306_p10), 257024  }
  0x16   : > { %s4482_s23 = scalar_select %p224_p11, %s4341_s29, %s226_s21  }
  0x17   : > { %3765 = vmatpush3.bf16.msra.mxu0 (!%p306_p10), %v4219_v0  ;;  %s3301_s20 = sshll.u32 (!%p306_p10), %s4345_s30, 3  ;;  %p352_p12 = scmp.lt.s32.totalorder (!%p306_p10), %s4349_s9, 1  ;;  %v4225_v7 = vld [vmem:[%s5322_s2 + $0x30] sm:$0xff] (!%p306_p10)   ;;  %v4226_v8 = vld [vmem:[%s5322_s2 + $0x38] sm:$0xff] (!%p306_p10)   ;;  %vm691_vm1 = vsmask.f32 (!%p306_p10), 256 }
  0x18   : > { %5344 = sst [smem:[#allocation12_spill]] %s4482_s23  ;;  %3766 = vmatprep.subr.bf16.mxu0 (!%p306_p10), %v4220_v1  ;;  %p354_p13 = scmp.lt.s32.totalorder (!%p306_p10), %s3301_s20, 15  ;;  %vm4540_vm2 = vmand (!%p306_p10), %vm690_vm0, %vm691_vm1  ;;  %v699_v19 = vld [vmem:[#allocation2 + $0x18] sm:$0x1] (!%p306_p10)  ;;  %vm723_vm3 = vsmask.f32 (!%p306_p10), 7938 }
  0x19   : > { %s3305_s17 = sshll.u32 (!%p306_p10), %s4349_s9, 1  ;;  %v700_v20 = vsel (!%p306_p10), %vm4540_vm2, 0, %v699_v19  ;;  %vm4548_vm4 = vmand (!%p306_p10), %vm690_vm0, %vm723_vm3  ;;  %v696_v22 = vld [vmem:[#allocation2 + $0xc] sm:$0x1] (!%p306_p10)  ;;  %v731_v24 = vld [vmem:[#allocation2 + $0x20] sm:$0x1] (!%p306_p10) }
  0x1a   : > { %s363_s15 = sadd.s32 (!%p306_p10), %s4345_s30, %s3305_s17  ;;  %701 = vst [vmem:[#allocation2 + $0x18] sm:$0x1] (!%p306_p10), %v700_v20  ;;  %v697_v23 = vsel (!%p306_p10), %vm4540_vm2, 0, %v696_v22  ;;  %v732_v25 = vsel (!%p306_p10), %vm4548_vm4, 0, %v731_v24  ;;  %v728_v26 = vld [vmem:[#allocation2 + $0x14] sm:$0x1] (!%p306_p10)  ;;  %vm4602_vm7 = vmand (!%p306_p10), %vm783_vm5, %vm723_vm3 }
  0x1b   : > { %3767 = vmatpush3.bf16.msra.mxu0 (!%p306_p10), %v4220_v1  ;;  %p364_p0 = scmp.lt.s32.totalorder (!%p306_p10), %s363_s15, 3  ;;  %698 = vst [vmem:[#allocation2 + $0xc] sm:$0x1] (!%p306_p10), %v697_v23  ;;  %733 = vst [vmem:[#allocation2 + $0x20] sm:$0x1] (!%p306_p10), %v732_v25  ;;  %v729_v27 = vsel (!%p306_p10), %vm4548_vm4, 0, %v728_v26 }
  0x1c   : > { %s353_s25 = scalar_select %p352_p12, %s4349_s9, 1  ;;  %3768 = vmatprep.subr.bf16.mxu0 %v4221_v2  ;;  %730 = vst [vmem:[#allocation2 + $0x14] sm:$0x1] %v729_v27  ;;  %v705_v28 = vld [vmem:[#allocation2 + $0x30] sm:$0x1] }
  0x1d   : > { %s5374_s20 = smov (!%p354_p13, %s3301_s20), 15  ;;  %s5376_s15 = smov (!%p364_p0, %s363_s15), 3  ;;  %v706_v29 = vsel %vm4540_vm2, 0, %v705_v28  ;;  %v702_v30 = vld [vmem:[#allocation2 + $0x24] sm:$0x1] }
  0x1e   : > { %s3303_s14 = sshll.u32 %s353_s25, 5  ;;  %s3302_s16 = sshll.u32 %s5374_s20, 1  ;;  %707 = vst [vmem:[#allocation2 + $0x30] sm:$0x1] %v706_v29  ;;  %v703_v31 = vsel %vm4540_vm2, 0, %v702_v30 }
  0x1f   : > { %s358_s11 = sadd.s32 %s3303_s14, %s3302_s16  ;;  %3769 = vmatpush3.bf16.msra.mxu0 %v4221_v2  ;;  %s3514_s24 = sshll.u32 %s5376_s15, 4  ;;  %704 = vst [vmem:[#allocation2 + $0x24] sm:$0x1] %v703_v31  ;;  %v737_v32 = vld [vmem:[#allocation2 + $0x38] sm:$0x1] }
  0x20   : > { %s3304_s10 = sshll.u32 %s358_s11, 2  ;;  %3770 = vmatprep.subr.bf16.mxu0 %v4222_v3  ;;  %s4524_s23 = scalar_lea.vmem %s5321_s1, %s3514_s24  ;;  %v738_v33 = vsel %vm4548_vm4, 0, %v737_v32  ;;  %v734_v34 = vld [vmem:[#allocation2 + $0x2c] sm:$0x1]  ;;  %v711_v36 = vld [vmem:[#allocation2 + $0x48] sm:$0x1] }
  0x21   : > { %s4512_s19 = scalar_lea.vmem %s5320_s0, %s3304_s10  ;;  %v4235_v16 = vld [vmem:[%s4524_s23] sm:$0xff]   ;;  %v4236_v17 = vld [vmem:[%s4524_s23 + $0x8] sm:$0xff]   ;;  %739 = vst [vmem:[#allocation2 + $0x38] sm:$0x1] %v738_v33  ;;  %v735_v35 = vsel %vm4548_vm4, 0, %v734_v34  ;;  %v712_v37 = vsel %vm4540_vm2, 0, %v711_v36 }
  0x22   : > { %v4227_v5 = vld [vmem:[%s4512_s19] sm:$0xff]   ;;  %v4228_v9 = vld [vmem:[%s4512_s19 + $0x8] sm:$0xff]   ;;  %v4229_v10 = vld [vmem:[%s4512_s19 + $0x10] sm:$0xff]   ;;  %736 = vst [vmem:[#allocation2 + $0x2c] sm:$0x1] %v735_v35  ;;  %s4710_s21 = scalar_lea.vmem [#allocation3], %s4490_s13 }
  0x23   : > { %3771 = vmatpush3.bf16.msra.mxu0 %v4222_v3  ;;  %3780 = vmatprep.mubr.bf16.mxu0 %v4227_v5  ;;  %v4230_v11 = vld [vmem:[%s4512_s19 + $0x18] sm:$0xff]   ;;  %v4231_v12 = vld [vmem:[%s4512_s19 + $0x20] sm:$0xff]   ;;  %v4232_v13 = vld [vmem:[%s4512_s19 + $0x28] sm:$0xff]   ;;  %713 = vst [vmem:[#allocation2 + $0x48] sm:$0x1] %v712_v37  ;;  %p3347_p1 = scmp.ne.s32.totalorder %s4345_s30, 0 }
  0x24   : > { %3772 = vmatprep.subr.bf16.mxu0 %v4223_v4  ;;  %v4233_v14 = vld [vmem:[%s4512_s19 + $0x30] sm:$0xff]   ;;  %v4234_v15 = vld [vmem:[%s4512_s19 + $0x38] sm:$0xff]   ;;  %v740_v42 = vld [vmem:[#allocation2 + $0x44] sm:$0x1]  ;;  %vm761_vm6 = vsmask.f32 4368 }
  0x25   : > { %v708_v38 = vld [vmem:[#allocation2 + $0x3c] sm:$0x1]  ;;  %v743_v40 = vld [vmem:[#allocation2 + $0x50] sm:$0x1]  ;;  %v741_v43 = vsel %vm4548_vm4, 0, %v740_v42  ;;  %vm4609_vm8 = vmor %vm691_vm1, %vm761_vm6 }
  0x26   : > { %v709_v39 = vsel %vm4540_vm2, 0, %v708_v38  ;;  %v744_v41 = vsel %vm4548_vm4, 0, %v743_v40  ;;  %742 = vst [vmem:[#allocation2 + $0x44] sm:$0x1] %v741_v43  ;;  %v717_v44 = vld [vmem:[#allocation2 + $0x60] sm:$0x1] }
  0x27   : > { %3773 = vmatpush3.bf16.msra.mxu0 %v4223_v4  ;;  %710 = vst [vmem:[#allocation2 + $0x3c] sm:$0x1] %v709_v39  ;;  %745 = vst [vmem:[#allocation2 + $0x50] sm:$0x1] %v744_v41  ;;  %v718_v45 = vsel %vm4540_vm2, 0, %v717_v44 }
  0x28   : > { %3774 = vmatprep.subr.bf16.mxu0 %v4224_v6  ;;  %v714_v46 = vld [vmem:[#allocation2 + $0x54] sm:$0x1]  ;;  %719 = vst [vmem:[#allocation2 + $0x60] sm:$0x1] %v718_v45  ;;  %v749_v48 = vld [vmem:[#allocation2 + $0x68] sm:$0x1] }
  0x29   : > { %v715_v47 = vsel %vm4540_vm2, 0, %v714_v46  ;;  %v750_v49 = vsel %vm4548_vm4, 0, %v749_v48  ;;  %v746_v50 = vld [vmem:[#allocation2 + $0x5c] sm:$0x1]  ;;  %v720_v52 = vld [vmem:[#allocation2 + $0x6c] sm:$0x1] }
  0x2a   : > { %716 = vst [vmem:[#allocation2 + $0x54] sm:$0x1] %v715_v47  ;;  %751 = vst [vmem:[#allocation2 + $0x68] sm:$0x1] %v750_v49  ;;  %v747_v51 = vsel %vm4548_vm4, 0, %v746_v50  ;;  %v721_v53 = vsel %vm4540_vm2, 0, %v720_v52 }
  0x2b   : > { %3775 = vmatpush3.bf16.msra.mxu0 %v4224_v6  ;;  %748 = vst [vmem:[#allocation2 + $0x5c] sm:$0x1] %v747_v51  ;;  %v693_v54 = vld [vmem:[#allocation2] sm:$0x1]  ;;  %722 = vst [vmem:[#allocation2 + $0x6c] sm:$0x1] %v721_v53 }
  0x2c   : > { %3776 = vmatprep.subr.bf16.mxu0 %v4225_v7  ;;  %v694_v55 = vsel %vm4540_vm2, 0, %v693_v54  ;;  %v752_v56 = vld [vmem:[#allocation2 + $0x74] sm:$0x1]  ;;  %v725_v58 = vld [vmem:[#allocation2 + $0x8] sm:$0x1] }
  0x2d   : > { %695 = vst [vmem:[#allocation2] sm:$0x1] %v694_v55  ;;  %v753_v57 = vsel %vm4548_vm4, 0, %v752_v56  ;;  %v726_v59 = vsel %vm4548_vm4, 0, %v725_v58  ;;  %v4593_v60 = vld [vmem:[%s5323_s3] ss:$0 sm:$0xff] }
  0x2e   : > { %754 = vst [vmem:[#allocation2 + $0x74] sm:$0x1] %v753_v57  ;;  %727 = vst [vmem:[#allocation2 + $0x8] sm:$0x1] %v726_v59  ;;  %v1009_v25 = vld [vmem:[#allocation2 + $0x18] sm:$0xf] }
  0x2f   : > { %3777 = vmatpush3.bf16.msra.mxu0 %v4225_v7  ;;  %v1002_v33 = vld [vmem:[#allocation2 + $0xc] sm:$0xf]  ;;  %v1013_v40 = vld [vmem:[#allocation2 + $0x20] sm:$0x1]  ;;  %v1006_v46 = vld [vmem:[#allocation2 + $0x14] sm:$0x1] }
  0x30   : > { %3778 = vmatprep.subr.bf16.mxu0 %v4226_v8 }
  0x33   : > { %3779 = vmatpush3.bf16.msra.mxu0 %v4226_v8 }
  0x34   : > { %3796 = vmatprep.subr.bf16.mxu0 %v4219_v0 }
  0x36   : > { %3781 = vmatmul.mubr.bf16.vlgmr.msra.gmra.mrb[0].mxu0 %v4228_v9 }
  0x37   : > { %3797 = vmatpush3.bf16.msra.mxu0 %v4219_v0  ;;  %3784 = vmatprep.mubr.bf16.mxu0 %v4229_v10 }
  0x38   : > { %3798 = vmatprep.subr.bf16.mxu0 %v4220_v1 }
  0x3b   : > { %3799 = vmatpush3.bf16.msra.mxu0 %v4220_v1 }
  0x3c   : > { %3800 = vmatprep.subr.bf16.mxu0 %v4221_v2 }
  0x3e   : > { %3785 = vmatmul.mubr.bf16.gmra.mrb[4].mxu0 %v4230_v11 }
  0x3f   : > { %3801 = vmatpush3.bf16.msra.mxu0 %v4221_v2  ;;  %3788 = vmatprep.mubr.bf16.mxu0 %v4231_v12 }
  0x40   : > { %3802 = vmatprep.subr.bf16.mxu0 %v4222_v3 }
  0x43   : > { %3803 = vmatpush3.bf16.msra.mxu0 %v4222_v3 }
  0x44   : > { %3804 = vmatprep.subr.bf16.mxu0 %v4223_v4 }
  0x46   : > { %3789 = vmatmul.mubr.bf16.gmra.mrb[8].mxu0 %v4232_v13 }
  0x47   : > { %3805 = vmatpush3.bf16.msra.mxu0 %v4223_v4  ;;  %3792 = vmatprep.mubr.bf16.mxu0 %v4233_v14 }
  0x48   : > { %3806 = vmatprep.subr.bf16.mxu0 %v4224_v6 }
  0x4b   : > { %3807 = vmatpush3.bf16.msra.mxu0 %v4224_v6 }
  0x4c   : > { %3808 = vmatprep.subr.bf16.mxu0 %v4225_v7 }
  0x4e   : > { %3793 = vmatmul.mubr.bf16.gmra.mrb[12].mxu0 %v4234_v15 }
  0x4f   : > { %3809 = vmatpush3.bf16.msra.mxu0 %v4225_v7  ;;  %3812 = vmatprep.mubr.bf16.mxu0 %v4235_v16 }
  0x50   : > { %3810 = vmatprep.subr.bf16.mxu0 %v4226_v8 }
  0x53   : > { %3811 = vmatpush3.bf16.msra.mxu0 %v4226_v8 }
  0x56   : > { %3813 = vmatmul.mubr.bf16.vlgmr.msra.gmra.mrb[16].mxu0 %v4236_v17 }
 0x109   : > { %v3782_v61 = vpop.f32.mrb[0].mxu0 }
 0x10a   : > { %v551_v62 = vadd.f32 %v3782_v61, %v4593_v60  ;;  %v542_v63 = vpop.f32.mrb[1].mxu0 }
 0x10b   : > { %v543_v0 = vadd.f32 %v4593_v60, %v542_v63  ;;  %v3783_v1 = vpop.f32.mrb[2].mxu0 }
 0x10c   : > { %v607_v2 = vmax.f32 %v551_v62, 0.0  ;;  %v554_v3 = vadd.f32 %v3783_v1, %v4593_v60  ;;  %v545_v4 = vpop.f32.mrb[3].mxu0 }
 0x10d   : > { %v605_v5 = vmax.f32 %v543_v0, 0.0  ;;  %v546_v6 = vadd.f32 %v4593_v60, %v545_v4 }
 0x10e   : > { %v3519_v7 = vpack.c.bf16 %v607_v2, %v607_v2  ;;  %v608_v8 = vmax.f32 %v554_v3, 0.0  ;;  %v1023_v2 = vld [vmem:[#allocation2 + $0x30] sm:$0xf] }
 0x10f   : > { %v3517_v9 = vpack.c.bf16 %v605_v5, %v605_v5  ;;  %v606_v10 = vmax.f32 %v546_v6, 0.0 }
 0x110   : > { %v859_v11 = vshrl.u32 %v3519_v7, 16  ;;  %v3520_v12 = vpack.c.bf16 %v608_v8, %v608_v8  ;;  %v862_v13 = vshll.u32 %v3519_v7, 16 }
 0x111   : > { %v842_v14 = vshrl.u32 %v3517_v9, 16  ;;  %v845_v15 = vshll.u32 %v3517_v9, 16  ;;  %v3518_v16 = vpack.c.bf16 %v606_v10, %v606_v10  ;;  %v3786_v17 = vpop.f32.mrb[4].mxu0  ;;  %v1016_v9 = vld [vmem:[#allocation2 + $0x24] sm:$0xf] }
 0x112   : > { %v861_v19 = vrot.slane %v859_v11, 7  ;;  %v867_v20 = vshrl.u32 %v3520_v12, 16  ;;  %v870_v21 = vshll.u32 %v3520_v12, 16  ;;  %v567_v22 = vadd.f32 %v3786_v17, %v4593_v60  ;;  %v558_v23 = vpop.f32.mrb[5].mxu0 }
 0x113   : > { %v844_v26 = vrot.slane %v842_v14, 7  ;;  %v850_v27 = vshrl.u32 %v3518_v16, 16  ;;  %v853_v28 = vshll.u32 %v3518_v16, 16  ;;  %v559_v29 = vadd.f32 %v4593_v60, %v558_v23  ;;  %v3787_v30 = vpop.f32.mrb[6].mxu0 }
 0x114   : > { %v864_v31 = vor.u32 %v862_v13, %v861_v19  ;;  %v865_v32 = vrot.slane %v861_v19, 4  ;;  %v869_v34 = vrot.slane %v867_v20, 7  ;;  %v611_v35 = vmax.f32 %v567_v22, 0.0  ;;  %v561_v36 = vpop.f32.mrb[7].mxu0 }
 0x115   : > { %v847_v37 = vor.u32 %v845_v15, %v844_v26  ;;  %v848_v38 = vrot.slane %v844_v26, 4  ;;  %v852_v41 = vrot.slane %v850_v27, 7  ;;  %v609_v42 = vmax.f32 %v559_v29, 0.0 }
 0x116   : > { %v1010_v43 = vsel %vm4602_vm7, %v864_v31, %v1009_v25  ;;  %v872_v44 = vor.u32 %v870_v21, %v869_v34  ;;  %v874_v45 = vrot.slane %v869_v34, 4  ;;  %v3523_v47 = vpack.c.bf16 %v611_v35, %v611_v35  ;;  %v1027_v31 = vld [vmem:[#allocation2 + $0x38] sm:$0x1] }
 0x117   : > { %1011 = vst [vmem:[#allocation2 + $0x18] sm:$0xf] %v1010_v43  ;;  %v1003_v48 = vsel %vm4602_vm7, %v847_v37, %v1002_v33  ;;  %v855_v49 = vor.u32 %v853_v28, %v852_v41  ;;  %v857_v50 = vrot.slane %v852_v41, 4  ;;  %v3521_v51 = vpack.c.bf16 %v609_v42, %v609_v42 }
 0x118   : > { %1004 = vst [vmem:[#allocation2 + $0xc] sm:$0xf] %v1003_v48  ;;  %v873_v52 = vsel %vm4609_vm8, %v865_v32, %v872_v44  ;;  %v1014_v53 = vsel %vm4540_vm2, %v874_v45, %v1013_v40  ;;  %v893_v54 = vshrl.u32 %v3523_v47, 16  ;;  %v896_v57 = vshll.u32 %v3523_v47, 16  ;;  %v1020_v32 = vld [vmem:[#allocation2 + $0x2c] sm:$0x1] }
 0x119   : > { %1012 = vst.msk [vmem:[#allocation2 + $0x1c] sm:$0xf] %vm783_vm5, %v873_v52  ;;  %1015 = vst [vmem:[#allocation2 + $0x20] sm:$0x1] %v1014_v53  ;;  %v856_v55 = vsel %vm4609_vm8, %v848_v38, %v855_v49  ;;  %v1007_v56 = vsel %vm4540_vm2, %v857_v50, %v1006_v46  ;;  %v876_v58 = vshrl.u32 %v3521_v51, 16  ;;  %v3790_v59 = vpop.f32.mrb[8].mxu0  ;;  %v570_v62 = vadd.f32 %v3787_v30, %v4593_v60 }
 0x11a   : > { %1005 = vst.msk [vmem:[#allocation2 + $0x10] sm:$0xf] %vm783_vm5, %v856_v55  ;;  %1008 = vst [vmem:[#allocation2 + $0x14] sm:$0x1] %v1007_v56  ;;  %v4627_v61 = vrot.slane %v893_v54, 7  ;;  %v562_v63 = vadd.f32 %v4593_v60, %v561_v36  ;;  %v583_v0 = vadd.f32 %v3790_v59, %v4593_v60  ;;  %v574_v1 = vpop.f32.mrb[9].mxu0 }
 0x11b   : > { %v878_v3 = vrot.slane %v876_v58, 7  ;;  %v879_v4 = vshll.u32 %v3521_v51, 16  ;;  %v575_v5 = vadd.f32 %v4593_v60, %v574_v1  ;;  %v3791_v6 = vpop.f32.mrb[10].mxu0  ;;  %v612_v10 = vmax.f32 %v570_v62, 0.0  ;;  %v1037_v45 = vld [vmem:[#allocation2 + $0x48] sm:$0xf] }
 0x11c   : > { %v898_v7 = vor.u32 %v896_v57, %v4627_v61  ;;  %v899_v8 = vrot.slane %v4627_v61, 4  ;;  %v610_v11 = vmax.f32 %v562_v63, 0.0  ;;  %v577_v12 = vpop.f32.mrb[11].mxu0  ;;  %v615_v15 = vmax.f32 %v583_v0, 0.0  ;;  %v1030_v54 = vld [vmem:[#allocation2 + $0x3c] sm:$0xf] }
 0x11d   : > { %v881_v13 = vor.u32 %v879_v4, %v878_v3  ;;  %v882_v14 = vrot.slane %v878_v3, 4  ;;  %v613_v16 = vmax.f32 %v575_v5, 0.0  ;;  %v3524_v19 = vpack.c.bf16 %v612_v10, %v612_v10 }
 0x11e   : > { %v1024_v17 = vsel %vm4602_vm7, %v898_v7, %v1023_v2  ;;  %v3522_v20 = vpack.c.bf16 %v610_v11, %v610_v11  ;;  %v586_v21 = vadd.f32 %v3791_v6, %v4593_v60  ;;  %v3527_v23 = vpack.c.bf16 %v615_v15, %v615_v15 }
 0x11f   : > { %1025 = vst [vmem:[#allocation2 + $0x30] sm:$0xf] %v1024_v17  ;;  %v1017_v22 = vsel %vm4602_vm7, %v881_v13, %v1016_v9  ;;  %v3525_v25 = vpack.c.bf16 %v613_v16, %v613_v16  ;;  %v578_v26 = vadd.f32 %v4593_v60, %v577_v12  ;;  %v901_v27 = vshrl.u32 %v3524_v19, 16 }
 0x120   : > { %1018 = vst [vmem:[#allocation2 + $0x24] sm:$0xf] %v1017_v22  ;;  %v904_v28 = vshll.u32 %v3524_v19, 16  ;;  %v884_v29 = vshrl.u32 %v3522_v20, 16  ;;  %v887_v30 = vshll.u32 %v3522_v20, 16  ;;  %v927_v33 = vshrl.u32 %v3527_v23, 16 }
 0x121   : > { %v930_v34 = vshll.u32 %v3527_v23, 16  ;;  %v910_v35 = vshrl.u32 %v3525_v25, 16  ;;  %v913_v36 = vshll.u32 %v3525_v25, 16  ;;  %v3794_v37 = vpop.f32.mrb[12].mxu0  ;;  %v903_v38 = vrot.slane %v901_v27, 7 }
 0x122   : > { %v886_v40 = vrot.slane %v884_v29, 7  ;;  %v616_v41 = vmax.f32 %v586_v21, 0.0  ;;  %v614_v42 = vmax.f32 %v578_v26, 0.0  ;;  %v590_v43 = vpop.f32.mrb[13].mxu0  ;;  %v4641_v44 = vrot.slane %v927_v33, 7 }
 0x123   : > { %v4643_v46 = vrot.slane %v910_v35, 7  ;;  %v599_v47 = vadd.f32 %v3794_v37, %v4593_v60  ;;  %v591_v48 = vadd.f32 %v4593_v60, %v590_v43  ;;  %v3795_v49 = vpop.f32.mrb[14].mxu0  ;;  %v906_v50 = vor.u32 %v904_v28, %v903_v38  ;;  %v1034_v23 = vld [vmem:[#allocation2 + $0x44] sm:$0x1] }
 0x124   : > { %v908_v51 = vrot.slane %v903_v38, 4  ;;  %v889_v52 = vor.u32 %v887_v30, %v886_v40  ;;  %v891_v53 = vrot.slane %v886_v40, 4  ;;  %v593_v55 = vpop.f32.mrb[15].mxu0  ;;  %v932_v56 = vor.u32 %v930_v34, %v4641_v44 }
 0x125   : > { %v933_v57 = vrot.slane %v4641_v44, 4  ;;  %v915_v58 = vor.u32 %v913_v36, %v4643_v46  ;;  %v916_v59 = vrot.slane %v4643_v46, 4  ;;  %v907_v61 = vsel %vm4609_vm8, %v899_v8, %v906_v50  ;;  %v1051_v46 = vld [vmem:[#allocation2 + $0x60] sm:$0xf] }
 0x126   : > { %v1028_v62 = vsel %vm4540_vm2, %v908_v51, %v1027_v31  ;;  %v890_v63 = vsel %vm4609_vm8, %v882_v14, %v889_v52  ;;  %v1021_v0 = vsel %vm4540_vm2, %v891_v53, %v1020_v32  ;;  %1026 = vst.msk [vmem:[#allocation2 + $0x34] sm:$0xf] %vm783_vm5, %v907_v61  ;;  %v1038_v1 = vsel %vm4602_vm7, %v932_v56, %v1037_v45  ;;  %v1041_v14 = vld [vmem:[#allocation2 + $0x50] sm:$0x1] }
 0x127   : > { %1029 = vst [vmem:[#allocation2 + $0x38] sm:$0x1] %v1028_v62  ;;  %1019 = vst.msk [vmem:[#allocation2 + $0x28] sm:$0xf] %vm783_vm5, %v890_v63  ;;  %v1031_v2 = vsel %vm4602_vm7, %v915_v58, %v1030_v54  ;;  %v3528_v3 = vpack.c.bf16 %v616_v41, %v616_v41  ;;  %v3526_v4 = vpack.c.bf16 %v614_v42, %v614_v42  ;;  %v619_v5 = vmax.f32 %v599_v47, 0.0 }
 0x128   : > { %1022 = vst [vmem:[#allocation2 + $0x2c] sm:$0x1] %v1021_v0  ;;  %1039 = vst [vmem:[#allocation2 + $0x48] sm:$0xf] %v1038_v1  ;;  %v617_v6 = vmax.f32 %v591_v48, 0.0  ;;  %v602_v7 = vadd.f32 %v3795_v49, %v4593_v60  ;;  %v594_v8 = vadd.f32 %v4593_v60, %v593_v55 }
 0x129   : > { %1032 = vst [vmem:[#allocation2 + $0x3c] sm:$0xf] %v1031_v2  ;;  %v935_v9 = vshrl.u32 %v3528_v3, 16  ;;  %v938_v10 = vshll.u32 %v3528_v3, 16  ;;  %v918_v11 = vshrl.u32 %v3526_v4, 16  ;;  %v921_v12 = vshll.u32 %v3526_v4, 16 }
 0x12a   : > { %v3814_v13 = vpop.f32.mrb[16].mxu0  ;;  %v3531_v15 = vpack.c.bf16 %v619_v5, %v619_v5  ;;  %v3529_v16 = vpack.c.bf16 %v617_v6, %v617_v6  ;;  %v620_v17 = vmax.f32 %v602_v7, 0.0  ;;  %v618_v19 = vmax.f32 %v594_v8, 0.0  ;;  %v1044_v47 = vld [vmem:[#allocation2 + $0x54] sm:$0xf] }
 0x12b   : > { %v671_v20 = vpop.f32.mrb[17].mxu0  ;;  %v937_v21 = vrot.slane %v935_v9, 7  ;;  %v920_v22 = vrot.slane %v918_v11, 7  ;;  %v680_v25 = vadd.f32 %v3814_v13, %v4593_v60  ;;  %v1055_v63 = vld [vmem:[#allocation2 + $0x68] sm:$0x1] }
 0x12c   : > { %v672_v26 = vadd.f32 %v4593_v60, %v671_v20  ;;  %v3815_v27 = vpop.f32.mrb[18].mxu0  ;;  %v961_v28 = vshrl.u32 %v3531_v15, 16  ;;  %v964_v29 = vshll.u32 %v3531_v15, 16  ;;  %v944_v30 = vshrl.u32 %v3529_v16, 16  ;;  %v1048_v0 = vld [vmem:[#allocation2 + $0x5c] sm:$0x1] }
 0x12d   : > { %v947_v31 = vshll.u32 %v3529_v16, 16  ;;  %v674_v32 = vpop.f32.mrb[19].mxu0  ;;  %v940_v33 = vor.u32 %v938_v10, %v937_v21  ;;  %v942_v34 = vrot.slane %v937_v21, 4  ;;  %v923_v35 = vor.u32 %v921_v12, %v920_v22  ;;  %v1085_v21 = vld [vmem:[#allocation2 + $0x6c] sm:$0xf] }
 0x12e   : > { %v925_v36 = vrot.slane %v920_v22, 4  ;;  %v963_v37 = vrot.slane %v961_v28, 7  ;;  %v946_v38 = vrot.slane %v944_v30, 7  ;;  %v3532_v40 = vpack.c.bf16 %v620_v17, %v620_v17  ;;  %v785_v22 = vld [vmem:[#allocation2] sm:$0xf] }
 0x12f   : > { %v3530_v41 = vpack.c.bf16 %v618_v19, %v618_v19  ;;  %v941_v42 = vsel %vm4609_vm8, %v933_v57, %v940_v33  ;;  %v1042_v43 = vsel %vm4540_vm2, %v942_v34, %v1041_v14  ;;  %v924_v44 = vsel %vm4609_vm8, %v916_v59, %v923_v35 }
 0x130   : > { %v1035_v45 = vsel %vm4540_vm2, %v925_v36, %v1034_v23  ;;  %1040 = vst.msk [vmem:[#allocation2 + $0x4c] sm:$0xf] %vm783_vm5, %v941_v42  ;;  %1043 = vst [vmem:[#allocation2 + $0x50] sm:$0x1] %v1042_v43  ;;  %v966_v48 = vor.u32 %v964_v29, %v963_v37  ;;  %v949_v49 = vor.u32 %v947_v31, %v946_v38  ;;  %v967_v50 = vrot.slane %v963_v37, 4 }
 0x131   : > { %1033 = vst.msk [vmem:[#allocation2 + $0x40] sm:$0xf] %vm783_vm5, %v924_v44  ;;  %1036 = vst [vmem:[#allocation2 + $0x44] sm:$0x1] %v1035_v45  ;;  %v950_v51 = vrot.slane %v946_v38, 4  ;;  %v969_v52 = vshrl.u32 %v3532_v40, 16  ;;  %v683_v3 = vadd.f32 %v3815_v27, %v4593_v60  ;;  %v675_v4 = vadd.f32 %v4593_v60, %v674_v32 }
 0x132   : > { %v952_v53 = vshrl.u32 %v3530_v41, 16  ;;  %v1052_v54 = vsel %vm4602_vm7, %v966_v48, %v1051_v46  ;;  %v1045_v55 = vsel %vm4602_vm7, %v949_v49, %v1044_v47  ;;  %v688_v56 = vmax.f32 %v680_v25, 0.0  ;;  %v1089_v38 = vld [vmem:[#allocation2 + $0x74] sm:$0x1] }
 0x133   : > { %v686_v57 = vmax.f32 %v672_v26, 0.0  ;;  %1053 = vst [vmem:[#allocation2 + $0x60] sm:$0xf] %v1052_v54  ;;  %1046 = vst [vmem:[#allocation2 + $0x54] sm:$0xf] %v1045_v55  ;;  %v971_v58 = vrot.slane %v969_v52, 7 }
 0x134   : > { %v972_v59 = vshll.u32 %v3532_v40, 16  ;;  %v954_v61 = vrot.slane %v952_v53, 7  ;;  %v955_v62 = vshll.u32 %v3530_v41, 16  ;;  %v3533_v1 = vpack.c.bf16 %v688_v56, %v688_v56  ;;  %v790_v40 = vld [vmem:[#allocation2 + $0x8] sm:$0x1] }
 0x135   : > { %v3515_v2 = vpack.c.bf16 %v686_v57, %v686_v57  ;;  %v976_v6 = vrot.slane %v971_v58, 4  ;;  %v689_v19 = vmax.f32 %v683_v3, 0.0  ;;  %v687_v20 = vmax.f32 %v675_v4, 0.0 }
 0x136   : > { %v974_v5 = vor.u32 %v972_v59, %v971_v58  ;;  %v957_v7 = vor.u32 %v955_v62, %v954_v61  ;;  %v959_v8 = vrot.slane %v954_v61, 4  ;;  %v1065_v9 = vshrl.u32 %v3533_v1, 16 }
 0x137   : > { %v1068_v10 = vshll.u32 %v3533_v1, 16  ;;  %v764_v11 = vshrl.u32 %v3515_v2, 16  ;;  %v767_v12 = vshll.u32 %v3515_v2, 16  ;;  %v1056_v14 = vsel %vm4540_vm2, %v976_v6, %v1055_v63 }
 0x138   : > { %v975_v13 = vsel %vm4609_vm8, %v967_v50, %v974_v5  ;;  %v958_v15 = vsel %vm4609_vm8, %v950_v51, %v957_v7  ;;  %v1049_v60 = vsel %vm4540_vm2, %v959_v8, %v1048_v0  ;;  %1057 = vst [vmem:[#allocation2 + $0x68] sm:$0x1] %v1056_v14  ;;  %v1067_v16 = vrot.slane %v1065_v9, 7 }
 0x139   : > { %1054 = vst.msk [vmem:[#allocation2 + $0x64] sm:$0xf] %vm783_vm5, %v975_v13  ;;  %1047 = vst.msk [vmem:[#allocation2 + $0x58] sm:$0xf] %vm783_vm5, %v958_v15  ;;  %v766_v17 = vrot.slane %v764_v11, 7  ;;  %v3534_v26 = vpack.c.bf16 %v689_v19, %v689_v19  ;;  %v3516_v27 = vpack.c.bf16 %v687_v20, %v687_v20  ;;  %v4363_v48 = vmov (!%p3347_p1), 0  }
 0x13a   : > { %1050 = vst [vmem:[#allocation2 + $0x5c] sm:$0x1] %v1049_v60  ;;  %v1070_v23 = vor.u32 %v1068_v10, %v1067_v16  ;;  %v1071_v36 = vrot.slane %v1067_v16, 4 }
 0x13b   : > { %v769_v25 = vor.u32 %v767_v12, %v766_v17  ;;  %v1073_v30 = vshrl.u32 %v3534_v26, 16  ;;  %v772_v31 = vshrl.u32 %v3516_v27, 16  ;;  %v1076_v33 = vshll.u32 %v3534_v26, 16 }
 0x13c   : > { %v1086_v28 = vsel %vm4602_vm7, %v1070_v23, %v1085_v21  ;;  %v775_v35 = vshll.u32 %v3516_v27, 16  ;;  %v770_v37 = vrot.slane %v766_v17, 4 }
 0x13d   : > { %v786_v29 = vsel %vm4602_vm7, %v769_v25, %v785_v22  ;;  %1087 = vst [vmem:[#allocation2 + $0x6c] sm:$0xf] %v1086_v28  ;;  %v1075_v32 = vrot.slane %v1073_v30, 7  ;;  %v774_v34 = vrot.slane %v772_v31, 7  ;;  %1095 = sbr.rel (%p3347_p1) target bundleno = 326 (0x146), region = 56 }
 0x13e   : > { %787 = vst [vmem:[#allocation2] sm:$0xf] %v786_v29 }
 0x13f   : > { %v1078_v41 = vor.u32 %v1076_v33, %v1075_v32  ;;  %v1080_v42 = vrot.slane %v1075_v32, 4  ;;  %v777_v43 = vor.u32 %v775_v35, %v774_v34  ;;  %v779_v44 = vrot.slane %v774_v34, 4  ;;  %1096 = vst.msk [vmem:[#allocation2] sm:$0xf] (!%p3347_p1), %vm783_vm5, %v4363_v48 }
 0x141   : > { %v1079_v24 = vsel %vm4609_vm8, %v1071_v36, %v1078_v41  ;;  %v1090_v45 = vsel %vm4540_vm2, %v1080_v42, %v1089_v38  ;;  %v778_v46 = vsel %vm4609_vm8, %v770_v37, %v777_v43  ;;  %v791_v47 = vsel %vm4540_vm2, %v779_v44, %v790_v40 }
 0x142   : > { %1088 = vst.msk [vmem:[#allocation2 + $0x70] sm:$0xf] %vm783_vm5, %v1079_v24  ;;  %1091 = vst [vmem:[#allocation2 + $0x74] sm:$0x1] %v1090_v45 }
 0x143   : > { %789 = vst.msk [vmem:[#allocation2 + $0x4] sm:$0xf] %vm783_vm5, %v778_v46  ;;  %792 = vst [vmem:[#allocation2 + $0x8] sm:$0x1] %v791_v47 }
 0x144   : > { %1097 = vst.msk [vmem:[#allocation2 + $0x4] sm:$0xf] %vm783_vm5, %v4363_v48 }
 0x145   : > { %1099 = vst.msk [vmem:[#allocation2 + $0x8] sm:$0x1] %vm690_vm0, %v4363_v48 }
 0x146 PF: > { %p3348_p2 = scmp.ne.s32.totalorder %s4345_s30, 1 }
 0x147   : > { %v4364_v18 = vmov (!%p3348_p2), 0  }
 0x148   : > { %1103 = sbr.rel (%p3348_p2) target bundleno = 335 (0x14f), region = 60  ;;  %1104 = vst.msk [vmem:[#allocation2 + $0x6c] sm:$0xf] (!%p3348_p2), %vm783_vm5, %v4364_v18  ;;  %1105 = vst.msk [vmem:[#allocation2 + $0x70] sm:$0xf] (!%p3348_p2), %vm783_vm5, %v4364_v18 }
 0x149   : > { %1107 = vst.msk [vmem:[#allocation2 + $0x74] sm:$0x1] (!%p3348_p2), %vm690_vm0, %v4364_v18 }
 0x14f PF: > { %v4237_v39 = vld [vmem:[%s5324_s4 + $0x10] sm:$0xff]   ;;  %v4238_v49 = vld [vmem:[%s5324_s4 + $0x18] sm:$0xff]   ;;  %v1564_v50 = vld [vmem:[#allocation2] sm:$0xf]  ;;  %vm1594_vm9 = vsmask.f32 3328 }
 0x150   : > { %3876 = vmatprep.subr.bf16.mxu1 %v4237_v39  ;;  %v4726_v51 = vld [vmem:[#allocation2 + $0x4] sm:$0xf]  ;;  %v4728_v52 = vld [vmem:[#allocation2 + $0x8] sm:$0x1]  ;;  %vm1595_vm10 = vsmask.f32 7440 }
 0x151   : > { %3877 = vmatpush3.bf16.msra.mxu1 %v4237_v39  ;;  %v1598_v53 = vshrl.u32 %v1564_v50, 16  ;;  %v1601_v54 = vshll.u32 %v1564_v50, 16  ;;  %v1607_v55 = vshll.u32 %v4726_v51, 16  ;;  %v1611_v56 = vshrl.u32 %v4726_v51, 16  ;;  %v4736_v61 = vld [vmem:[%s5324_s4 + $0x40] sm:$0xff]   ;;  %vm4744_vm11 = vmor %vm1594_vm9, %vm1595_vm10  ;;  %v4241_v12 = vld [vmem:[%s5324_s4 + $0x30] sm:$0xff]  }
 0x152   : > { %3878 = vmatprep.subr.bf16.mxu1 %v4238_v49  ;;  %v1617_v57 = vshll.u32 %v4728_v52, 16  ;;  %v1567_v1 = vld [vmem:[#allocation2 + $0xc] sm:$0xf]  ;;  %v4738_v3 = vld [vmem:[#allocation2 + $0x10] sm:$0xf]  ;;  %vm1188_vm12 = vcmask 261120   ;;  %3816 = vmatprep.subr.bf16.mxu0 %v4241_v12 }
 0x153   : > { %v1600_v58 = vrot.slane %v1598_v53, 4  ;;  %v1603_v59 = vrot.slane %v1601_v54, 5  ;;  %v1609_v62 = vrot.slane %v1607_v55, 5  ;;  %v1613_v63 = vrot.slane %v1611_v56, 4  ;;  %v4740_v4 = vld [vmem:[#allocation2 + $0x14] sm:$0x1]  ;;  %3817 = vmatpush3.bf16.msra.mxu0 %v4241_v12 }
 0x154   : > { %v1619_v0 = vrot.slane %v1617_v57, 5  ;;  %v1622_v5 = vshrl.u32 %v1567_v1, 16  ;;  %v1625_v6 = vshll.u32 %v1567_v1, 16  ;;  %v1631_v9 = vshll.u32 %v4738_v3, 16  ;;  %v1570_v60 = vld [vmem:[#allocation2 + $0x18] sm:$0xf] }
 0x155   : > { %3879 = vmatpush3.bf16.msra.mxu1 %v4238_v49  ;;  %v1604_v2 = vor.u32 %v1603_v59, %v1600_v58  ;;  %v1614_v8 = vor.u32 %v1613_v63, %v1609_v62  ;;  %v1635_v10 = vshrl.u32 %v4738_v3, 16  ;;  %v1641_v11 = vshll.u32 %v4740_v4, 16  ;;  %v4755_v20 = vld [vmem:[#allocation2 + $0x1c] sm:$0xf]  ;;  %v4760_v26 = vld [vmem:[#allocation2 + $0x20] sm:$0x1] }
 0x156   : > { %3896 = vmatprep.subr.bf16.mxu1 %v4736_v61  ;;  %v1624_v14 = vrot.slane %v1622_v5, 4  ;;  %v1627_v15 = vrot.slane %v1625_v6, 5  ;;  %v1633_v17 = vrot.slane %v1631_v9, 5  ;;  %v2330_v25 = vrot.slane %v4738_v3, 5  ;;  %v1573_v31 = vld [vmem:[#allocation2 + $0x24] sm:$0xf] }
 0x157   : > { %v1605_v13 = vrot.slane %v1604_v2, 4  ;;  %v1615_v16 = vrot.slane %v1614_v8, 4  ;;  %v1637_v19 = vrot.slane %v1635_v10, 4  ;;  %v1643_v23 = vrot.slane %v1641_v11, 5  ;;  %v4766_v36 = vld [vmem:[#allocation2 + $0x28] sm:$0xf] }
 0x158   : > { %v1628_v22 = vor.u32 %v1627_v15, %v1624_v14  ;;  %v1646_v29 = vshrl.u32 %v1570_v60, 16  ;;  %v1649_v30 = vshll.u32 %v1570_v60, 16  ;;  %v1655_v34 = vshll.u32 %v4755_v20, 16  ;;  %v4242_v37 = vld [vmem:[%s5324_s4 + $0x38] sm:$0xff]   ;;  %v4772_v43 = vld [vmem:[#allocation2 + $0x2c] sm:$0x1] }
 0x159   : > { %v1610_v21 = vsel %vm4744_vm11, %v1605_v13, %v1609_v62  ;;  %v1620_v27 = vsel %vm4744_vm11, %v1615_v16, %v1619_v0  ;;  %v1638_v28 = vor.u32 %v1637_v19, %v1633_v17  ;;  %v1659_v35 = vshrl.u32 %v4755_v20, 16  ;;  %3818 = vmatprep.subr.bf16.mxu0 %v4242_v37  ;;  %v4777_v47 = vld [vmem:[#allocation2 + $0xc] sm:$0xff]   ;;  %v4784_v57 = vld [vmem:[#allocation2 + $0x34] sm:$0xf]  ;;  %v4798_v12 = vld [vmem:[#allocation2 + $0x38] sm:$0x1] }
 0x15a   : > { %v3389_v32 = vcombine.low %v1610_v21, %v1620_v27  ;;  %v1629_v33 = vrot.slane %v1628_v22, 4  ;;  %v1648_v40 = vrot.slane %v1646_v29, 4  ;;  %v1651_v41 = vrot.slane %v1649_v30, 5  ;;  %v1576_v50 = vld [vmem:[#allocation2 + $0x30] sm:$0xf]  ;;  %3819 = vmatpush3.bf16.msra.mxu0 %v4242_v37  ;;  %v4240_v58 = vld [vmem:[%s5324_s4 + $0x48] sm:$0xff]   ;;  %3820 = vmatprep.mubr.msk.bf16.mxu0 %vm1188_vm12, %v4777_v47 }
 0x15b   : > { %v1639_v38 = vrot.slane %v1638_v28, 4  ;;  %v1665_v42 = vshll.u32 %v4760_v26, 16  ;;  %v1657_v24 = vrot.slane %v1655_v34, 5  ;;  %v1661_v45 = vrot.slane %v1659_v35, 4  ;;  %v1579_v13 = vld [vmem:[#allocation2 + $0x3c] sm:$0xf] }
 0x15c   : > { %3880 = vmatprep.mubr.msk.bf16.mxu1 %vm1188_vm12, %v3389_v32  ;;  %v1634_v44 = vsel %vm4744_vm11, %v1629_v33, %v1633_v17  ;;  %v1670_v46 = vshrl.u32 %v1573_v31, 16  ;;  %v1652_v18 = vor.u32 %v1651_v41, %v1648_v40  ;;  %v1673_v49 = vshll.u32 %v1573_v31, 16  ;;  %v4803_v17 = vld [vmem:[#allocation2 + $0x18] sm:$0xff]   ;;  %v4810_v27 = vld [vmem:[#allocation2 + $0x44] sm:$0x1]  ;;  %v4818_v33 = vld [vmem:[%s5324_s4 + $0x70] sm:$0xff]  }
 0x15d   : > { %v1644_v48 = vsel %vm4744_vm11, %v1639_v38, %v1643_v23  ;;  %v1667_v39 = vrot.slane %v1665_v42, 5  ;;  %v1662_v54 = vor.u32 %v1661_v45, %v1657_v24  ;;  %v1679_v56 = vshll.u32 %v4766_v36, 16  ;;  %v4808_v23 = vld [vmem:[#allocation2 + $0x40] sm:$0xf]  ;;  %v1582_v32 = vld [vmem:[#allocation2 + $0x48] sm:$0xf]  ;;  %3821 = vmatmul.mubr.msk.bf16.vlgmr.msra.gmra.mrb[20].mxu0 %vm1188_vm12, %v4803_v17 }
 0x15e   : > { %v4781_v53 = vcombine.low %v1634_v44, %v1644_v48  ;;  %v1672_v55 = vrot.slane %v1670_v46, 4  ;;  %v1653_v59 = vrot.slane %v1652_v18, 4  ;;  %v1675_v62 = vrot.slane %v1673_v49, 5  ;;  %v4824_v40 = vld [vmem:[#allocation2 + $0x4c] sm:$0xf]  ;;  %v4826_v41 = vld [vmem:[#allocation2 + $0x24] sm:$0xff]  }
 0x15f   : > { %v1683_v63 = vshrl.u32 %v4766_v36, 16  ;;  %v1689_v0 = vshll.u32 %v4772_v43, 16  ;;  %v1663_v1 = vrot.slane %v1662_v54, 4  ;;  %v1681_v2 = vrot.slane %v1679_v56, 5  ;;  %3824 = vmatprep.mubr.msk.bf16.mxu0 %vm1188_vm12, %v4826_v41  ;;  %v4840_v56 = vld [vmem:[#allocation2 + $0x50] sm:$0x1] }
 0x160   : > { %3881 = vmatmul.mubr.msk.bf16.vlgmr.msra.gmra.mrb[0].mxu1 %vm1188_vm12, %v4781_v53  ;;  %v1694_v5 = vshrl.u32 %v1576_v50, 16  ;;  %v1697_v6 = vshll.u32 %v1576_v50, 16  ;;  %v1658_v8 = vsel %vm4744_vm11, %v1653_v59, %v1657_v24  ;;  %v1676_v9 = vor.u32 %v1675_v62, %v1672_v55  ;;  %v4261_v7 = vld [vmem:[%s5324_s4 + $0x58] sm:$0xff]   ;;  %s3551_s16 = sshll.u32 %s4345_s30, 4  ;;  %s3510_s11 = sshll.u32 %s4349_s9, 5 }
 0x161   : > { %3897 = vmatpush3.bf16.msra.mxu1 %v4736_v61  ;;  %v1685_v10 = vrot.slane %v1683_v63, 4  ;;  %v1691_v11 = vrot.slane %v1689_v0, 5  ;;  %v1668_v14 = vsel %vm4744_vm11, %v1663_v1, %v1667_v39  ;;  %v1703_v16 = vshll.u32 %v4784_v57, 16  ;;  %v4842_v1 = vld [vmem:[#allocation2 + $0x58] sm:$0xf]  ;;  %s3196_s9 = sshll.u32 %s4710_s21, 4  ;;  %s5262_s9 = int_to_ptr.vmem [resolvable:$true] %s3196_s9 }
 0x162   : > { %v1696_v15 = vrot.slane %v1694_v5, 4  ;;  %v1699_v60 = vrot.slane %v1697_v6, 5  ;;  %3898 = vmatprep.subr.bf16.mxu1 %v4240_v58  ;;  %v4805_v61 = vcombine.low %v1658_v8, %v1668_v14  ;;  %v1677_v19 = vrot.slane %v1676_v9, 4  ;;  %s5357_s29 = sand.u32 1, %s4337_s28   ;;  %s4267_s23 = scalar_lea.vmem %s5262_s9, 1024 }
 0x163   : > { %v1686_v21 = vor.u32 %v1685_v10, %v1681_v2  ;;  %v1707_v22 = vshrl.u32 %v4784_v57, 16  ;;  %v1705_v29 = vrot.slane %v1703_v16, 5  ;;  %v1713_v30 = vshll.u32 %v4798_v12, 16  ;;  %s5268_s10 = scalar_lea.sflag [#allocation4], %s5357_s29  ;;  %p4268_p4 = scmp.ne.s32.totalorder %s5262_s9, %s4267_s23 }
 0x164   : > { %v1700_v28 = vor.u32 %v1699_v60, %v1696_v15  ;;  %v1718_v31 = vshrl.u32 %v1579_v13, 16  ;;  %3884 = vmatprep.mubr.msk.bf16.mxu1 %vm1188_vm12, %v4805_v61  ;;  %v1682_v34 = vsel %vm4744_vm11, %v1677_v19, %v1681_v2  ;;  %v1721_v38 = vshll.u32 %v1579_v13, 16  ;;  %v4844_v2 = vld [vmem:[#allocation2 + $0x30] sm:$0xff]   ;;  %s4365_s26 = smov [#allocation3]  }
 0x165   : > { %v1687_v35 = vrot.slane %v1686_v21, 4  ;;  %v1709_v37 = vrot.slane %v1707_v22, 4  ;;  %3899 = vmatpush3.bf16.msra.mxu1 %v4240_v58  ;;  %v1715_v44 = vrot.slane %v1713_v30, 5  ;;  %v1727_v45 = vshll.u32 %v4808_v23, 16  ;;  %v1585_v58 = vld [vmem:[#allocation2 + $0x54] sm:$0xf]  ;;  %3825 = vmatmul.mubr.msk.bf16.gmra.mrb[24].mxu0 %vm1188_vm12, %v4844_v2  ;;  %p4269_p5 = pnand %p4268_p4, %p4464_p3 }
 0x166   : > { %v1701_v42 = vrot.slane %v1700_v28, 4  ;;  %v1720_v24 = vrot.slane %v1718_v31, 4  ;;  %3916 = vmatprep.subr.bf16.mxu1 %v4818_v33  ;;  %v1723_v18 = vrot.slane %v1721_v38, 5  ;;  %v1731_v39 = vshrl.u32 %v4808_v23, 16  ;;  %v4854_v21 = vld [vmem:[#allocation2 + $0x5c] sm:$0x1] }
 0x167   : > { %v1692_v46 = vsel %vm4744_vm11, %v1687_v35, %v1691_v11  ;;  %v1710_v48 = vor.u32 %v1709_v37, %v1705_v29  ;;  %v1729_v54 = vrot.slane %v1727_v45, 5  ;;  %v1737_v55 = vshll.u32 %v4810_v27, 16  ;;  %v4858_v22 = vld [vmem:[#allocation2 + $0x3c] sm:$0xff]   ;;  %p4270_p6 = pneg %p4269_p5  ;;  %s4271_s14 = sshll.u32 %s4365_s26, 4  ;;  %s4272_s14 = int_to_ptr.vmem [resolvable:$false] %s4271_s14 }
 0x168   : > { %v4835_v49 = vcombine.low %v1682_v34, %v1692_v46  ;;  %v1706_v50 = vsel %vm4744_vm11, %v1701_v42, %v1705_v29  ;;  %v1724_v62 = vor.u32 %v1723_v18, %v1720_v24  ;;  %v1733_v63 = vrot.slane %v1731_v39, 4  ;;  %3828 = vmatprep.mubr.msk.bf16.mxu0 %vm1188_vm12, %v4858_v22  ;;  %v4873_v39 = vld [vmem:[#allocation2 + $0x48] sm:$0xff]   ;;  %s4273_s15 = scalar_lea.vmem %s4272_s14, 2048  ;;  %p4274_p7 = scmp.lt.s32.totalorder %s5262_s9, %s4272_s14 }
 0x169   : > { %v1711_v59 = vrot.slane %v1710_v48, 4  ;;  %v1742_v0 = vshrl.u32 %v1582_v32, 16  ;;  %v1739_v5 = vrot.slane %v1737_v55, 5  ;;  %v1745_v6 = vshll.u32 %v1582_v32, 16  ;;  %p4275_p9 = scmp.lt.s32.totalorder %s4273_s15, %s4267_s23 }
 0x16a   : > { %3885 = vmatmul.mubr.msk.bf16.gmra.mrb[4].mxu1 %vm1188_vm12, %v4835_v49  ;;  %v1751_v8 = vshll.u32 %v4824_v40, 16  ;;  %v1755_v9 = vshrl.u32 %v4824_v40, 16  ;;  %v1725_v11 = vrot.slane %v1724_v62, 4  ;;  %v1734_v13 = vor.u32 %v1733_v63, %v1729_v54 }
 0x16b   : > { %v1716_v10 = vsel %vm4744_vm11, %v1711_v59, %v1715_v44  ;;  %v1744_v14 = vrot.slane %v1742_v0, 4  ;;  %v1747_v60 = vrot.slane %v1745_v6, 5  ;;  %v1761_v30 = vshll.u32 %v4840_v56, 16  ;;  %p4276_p10 = por %p4275_p9, %p4274_p7 }
 0x16c   : > { %v4852_v15 = vcombine.low %v1706_v50, %v1716_v10  ;;  %v1753_v16 = vrot.slane %v1751_v8, 5  ;;  %v1757_v19 = vrot.slane %v1755_v9, 4  ;;  %v1730_v28 = vsel %vm4744_vm11, %v1725_v11, %v1729_v54  ;;  %v4253_v8 = vld [vmem:[%s5324_s4] sm:$0xff]   ;;  %v4254_v10 = vld [vmem:[%s5324_s4 + $0x8] sm:$0xff]  }
 0x16d   : > { %v1735_v29 = vrot.slane %v1734_v13, 4  ;;  %v1766_v31 = vshrl.u32 %v1585_v58, 16  ;;  %v1748_v32 = vor.u32 %v1747_v60, %v1744_v14  ;;  %v1769_v35 = vshll.u32 %v1585_v58, 16  ;;  %v4876_v58 = vld [vmem:[#allocation2 + $0x54] sm:$0xff]   ;;  %3829 = vmatmul.mubr.msk.bf16.gmra.mrb[28].mxu0 %vm1188_vm12, %v4873_v39  ;;  %3836 = vmatprep.subr.bf16.mxu0 %v4253_v8  ;;  %v1588_v14 = vld [vmem:[#allocation2 + $0x60] sm:$0xf]  ;;  %p4277_p11 = pnand %p4276_p10, %p4270_p6 }
 0x16e   : > { %3888 = vmatprep.mubr.msk.bf16.mxu1 %vm1188_vm12, %v4852_v15  ;;  %v1758_v34 = vor.u32 %v1757_v19, %v1753_v16  ;;  %v1775_v37 = vshll.u32 %v4842_v1, 16  ;;  %v1763_v42 = vrot.slane %v1761_v30, 5  ;;  %v1779_v24 = vshrl.u32 %v4842_v1, 16  ;;  %3832 = vmatprep.mubr.msk.bf16.mxu0 %vm1188_vm12, %v4876_v58  ;;  %v4904_v19 = vld [vmem:[#allocation2 + $0x60] sm:$0xff]  }
 0x16f   : > { %v1740_v38 = vsel %vm4744_vm11, %v1735_v29, %v1739_v5  ;;  %v1768_v44 = vrot.slane %v1766_v31, 4  ;;  %v1749_v46 = vrot.slane %v1748_v32, 4  ;;  %v1771_v18 = vrot.slane %v1769_v35, 5  ;;  %3837 = vmatpush3.bf16.msra.mxu0 %v4253_v8  ;;  %v4909_v30 = vld [vmem:[#allocation2 + $0x64] sm:$0xf] }
 0x170   : > { %v4871_v45 = vcombine.low %v1730_v28, %v1740_v38  ;;  %v1759_v48 = vrot.slane %v1758_v34, 4  ;;  %v1777_v50 = vrot.slane %v1775_v37, 5  ;;  %v1781_v54 = vrot.slane %v1779_v24, 4  ;;  %3838 = vmatprep.subr.bf16.mxu0 %v4254_v10  ;;  %v4255_v31 = vld [vmem:[#allocation2] sm:$0xff]   ;;  %v4250_v24 = vld [vmem:[%s5324_s4 + $0x78] sm:$0xff]  }
 0x171   : > { %v1785_v55 = vshll.u32 %v4854_v21, 16  ;;  %v1754_v59 = vsel %vm4744_vm11, %v1749_v46, %v1753_v16  ;;  %v1772_v63 = vor.u32 %v1771_v18, %v1768_v44  ;;  %vm2318_vm13 = vcmask 1042432   ;;  %v4258_v35 = vld [vmem:[%s5324_s4 + $0x60] sm:$0xff]   ;;  %v4935_v18 = vld [vmem:[#allocation2 + $0x68] sm:$0x1] }
 0x172   : > { %3889 = vmatmul.mubr.msk.bf16.gmra.mrb[8].mxu1 %vm1188_vm12, %v4871_v45  ;;  %v1764_v62 = vsel %vm4744_vm11, %v1759_v48, %v1763_v42  ;;  %v1782_v5 = vor.u32 %v1781_v54, %v1777_v50  ;;  %v2332_v60 = vrot.slane %v2330_v25, 4  ;;  %v2333_v28 = vrot.slane %v4740_v4, 5  ;;  %v2286_v8 = vld [vmem:[#allocation2 + $0x18] sm:$0xe] }
 0x173   : > { %v4884_v0 = vcombine.low %v1754_v59, %v1764_v62  ;;  %v1787_v6 = vrot.slane %v1785_v55, 5  ;;  %v1773_v9 = vrot.slane %v1772_v63, 4  ;;  %v1967_v32 = vshrl.u32 %v1588_v14, 16  ;;  %3839 = vmatpush3.bf16.msra.mxu0 %v4254_v10  ;;  %v4259_v55 = vld [vmem:[%s5324_s4 + $0x68] sm:$0xff]   ;;  %v2287_v10 = vld [vmem:[#allocation2 + $0x24] sm:$0xe] }
 0x174   : > { %v1783_v11 = vrot.slane %v1782_v5, 4  ;;  %v1970_v34 = vshll.u32 %v1588_v14, 16  ;;  %vm2319_vm14 = vcmask 1046532   ;;  %v1976_v4 = vshll.u32 %v4909_v30, 16  ;;  %3856 = vmatprep.subr.bf16.mxu0 %v4258_v35 }
 0x175   : > { %3892 = vmatprep.mubr.msk.bf16.mxu1 %vm1188_vm12, %v4884_v0  ;;  %v1778_v13 = vsel %vm4744_vm11, %v1773_v9, %v1777_v50  ;;  %3833 = vmatmul.mubr.msk.bf16.gmra.mrb[32].mxu0 %vm1188_vm12, %v4904_v19  ;;  %v1980_v37 = vshrl.u32 %v4909_v30, 16  ;;  %v2323_v38 = vrot.slane %v4726_v51, 5  ;;  %vm4925_vm15 = vmor %vm2318_vm13, %vm2319_vm14  ;;  %v2326_v44 = vrot.slane %v4728_v52, 5  ;;  %v2284_v51 = vld [vmem:[#allocation2] sm:$0xe] }
 0x176   : > { %v1788_v16 = vsel %vm4744_vm11, %v1783_v11, %v1787_v6  ;;  %3840 = vmatprep.mubr.msk.bf16.mxu0 %vm1188_vm12, %v4255_v31  ;;  %v2334_v42 = vsel %vm4925_vm15, %v2332_v60, %v2333_v28  ;;  %v1969_v46 = vrot.slane %v1967_v32, 4  ;;  %v1972_v48 = vrot.slane %v1970_v34, 5  ;;  %v2285_v52 = vld [vmem:[#allocation2 + $0xc] sm:$0xe]  ;;  %v2288_v60 = vld [vmem:[#allocation2 + $0x30] sm:$0xe] }
 0x177   : > { %v4907_v29 = vcombine.low %v1778_v13, %v1788_v16  ;;  %v4937_v50 = vrot.slane %v1976_v4, 5  ;;  %v4939_v54 = vrot.slane %v1980_v37, 4  ;;  %v3429_v59 = vrot.slane %v2284_v51, 9  ;;  %v2289_v4 = vld [vmem:[#allocation2 + $0x3c] sm:$0xe] }
 0x178   : > { %v2325_v62 = vrot.slane %v2323_v38, 4  ;;  %v2337_v63 = vrot.slane %v4755_v20, 5  ;;  %v3430_v6 = vrot.slane %v2285_v52, 9  ;;  %v2340_v9 = vrot.slane %v4760_v26, 5  ;;  %v4964_v26 = vld [vmem:[%s5324_s4 + $0x20] sm:$0xff]  }
 0x179   : > { %v4949_v5 = vsel %vm4925_vm15, %v3429_v59, %v2323_v38  ;;  %v1973_v11 = vor.u32 %v1972_v48, %v1969_v46  ;;  %v3431_v13 = vrot.slane %v2286_v8, 9  ;;  %v3432_v28 = vrot.slane %v2287_v10, 9  ;;  %v2291_v48 = vld [vmem:[#allocation2 + $0x54] sm:$0xe] }
 0x17a   : > { %3893 = vmatmul.mubr.msk.bf16.gmra.mrb[12].mxu1 %vm1188_vm12, %v4907_v29  ;;  %v4957_v20 = vsel %vm4925_vm15, %v2325_v62, %v2326_v44  ;;  %v2339_v14 = vrot.slane %v2337_v63, 4  ;;  %v2331_v16 = vsel %vm4925_vm15, %v3430_v6, %v2330_v25  ;;  %v1986_v31 = vshll.u32 %v4935_v18, 16  ;;  %v2290_v44 = vld [vmem:[#allocation2 + $0x48] sm:$0xe] }
 0x17b   : > { %3900 = vmatprep.mubr.msk.bf16.mxu1 %vm1188_vm12, %v4781_v53  ;;  %v2338_v32 = vsel %vm4925_vm15, %v3431_v13, %v2337_v63  ;;  %v2344_v34 = vrot.slane %v4766_v36, 5  ;;  %v1983_v3 = vor.u32 %v4939_v54, %v4937_v50  ;;  %v2347_v37 = vrot.slane %v4772_v43, 5  ;;  %v4257_v53 = vld [vmem:[%s5324_s4 + $0x28] sm:$0xff]  }
 0x17c   : > { %v2341_v25 = vsel %vm4925_vm15, %v2339_v14, %v2340_v9  ;;  %v3433_v38 = vrot.slane %v2288_v60, 9  ;;  %v2351_v51 = vrot.slane %v4784_v57, 5  ;;  %v2354_v54 = vrot.slane %v4798_v12, 5 }
 0x17d   : > { %3841 = vmatmul.mubr.msk.bf16.vlgmr.msra.gmra.mrb[20].mxu0 %vm1188_vm12, %v4777_v47  ;;  %v4975_v47 = vcombine.low %v2331_v16, %v2334_v42  ;;  %v4987_v42 = vcombine.low %v2338_v32, %v2341_v25  ;;  %v2345_v36 = vsel %vm4925_vm15, %v3432_v28, %v2344_v34  ;;  %v2346_v46 = vrot.slane %v2344_v34, 4 }
 0x17e   : > { %3844 = vmatprep.mubr.msk.bf16.mxu0 %vm1188_vm12, %v4803_v17  ;;  %3857 = vmatpush3.bf16.msra.mxu0 %v4258_v35  ;;  %v4985_v35 = vrot.slane %v1973_v11, 4  ;;  %v3434_v59 = vrot.slane %v2289_v4, 9  ;;  %v2358_v43 = vrot.slane %v4808_v23, 5  ;;  %v2361_v62 = vrot.slane %v4810_v27, 5 }
 0x17f   : > { %3858 = vmatprep.subr.bf16.mxu0 %v4259_v55  ;;  %v3435_v52 = vrot.slane %v2290_v44, 9  ;;  %v2365_v63 = vrot.slane %v4824_v40, 5  ;;  %v2352_v57 = vsel %vm4925_vm15, %v3433_v38, %v2351_v51  ;;  %v2353_v12 = vrot.slane %v2351_v51, 4 }
 0x180   : > { %v2359_v23 = vsel %vm4925_vm15, %v3434_v59, %v2358_v43  ;;  %v2360_v27 = vrot.slane %v2358_v43, 4  ;;  %v2368_v9 = vrot.slane %v4840_v56, 5  ;;  %v3436_v11 = vrot.slane %v2291_v48, 9 }
 0x181   : > { %v2366_v40 = vsel %vm4925_vm15, %v3435_v52, %v2365_v63  ;;  %v2367_v8 = vrot.slane %v2365_v63, 4  ;;  %v2355_v10 = vsel %vm4925_vm15, %v2353_v12, %v2354_v54  ;;  %v2372_v13 = vrot.slane %v4842_v1, 5  ;;  %v2293_v54 = vld [vmem:[#allocation2 + $0x6c] sm:$0xe] }
 0x182   : > { %3901 = vmatmul.mubr.msk.bf16.vlgmr.msra.gmra.mrb[0].mxu1 %vm1188_vm12, %v4805_v61  ;;  %3859 = vmatpush3.bf16.msra.mxu0 %v4259_v55  ;;  %v2292_v55 = vld [vmem:[#allocation2 + $0x60] sm:$0xe]  ;;  %v2375_v14 = vrot.slane %v4854_v21, 5  ;;  %v5020_v60 = vcombine.low %v2352_v57, %v2355_v10  ;;  %v2362_v16 = vsel %vm4925_vm15, %v2360_v27, %v2361_v62  ;;  %v1984_v4 = vrot.slane %v1983_v3, 4  ;;  %v1593_v3 = vld [vmem:[#allocation2 + $0x74] sm:$0x1] }
 0x183   : > { %3917 = vmatpush3.bf16.msra.mxu1 %v4818_v33  ;;  %3904 = vmatprep.mubr.msk.bf16.mxu1 %vm1188_vm12, %v4835_v49  ;;  %v3437_v33 = vcombine.low %v4949_v5, %v4957_v20  ;;  %v2369_v56 = vsel %vm4925_vm15, %v2367_v8, %v2368_v9  ;;  %v3455_v28 = vrot.slane %v2292_v55, 9  ;;  %v5026_v32 = vcombine.low %v2359_v23, %v2362_v16  ;;  %v1591_v12 = vld [vmem:[#allocation2 + $0x6c] sm:$0xf] }
 0x184   : > { %3918 = vmatprep.subr.bf16.mxu1 %v4250_v24  ;;  %v5028_v34 = vcombine.low %v2366_v40, %v2369_v56  ;;  %v2373_v1 = vsel %vm4925_vm15, %v3436_v11, %v2372_v13  ;;  %v2374_v21 = vrot.slane %v2372_v13, 4  ;;  %v1988_v25 = vrot.slane %v1986_v31, 5  ;;  %v4266_v5 = vld [vmem:[%s5326_s6 + $0x8] sm:$0xff]  }
 0x185   : > { %3845 = vmatmul.mubr.msk.bf16.gmra.mrb[24].mxu0 %vm1188_vm12, %v4826_v41  ;;  %v2562_v38 = vrot.slane %v4935_v18, 5  ;;  %v1979_v31 = vsel %vm4744_vm11, %v4985_v35, %v4937_v50  ;;  %v2707_v43 = vrot.slane %v1593_v3, 5  ;;  %v3467_v50 = vrot.slane %v2293_v54, 9 }
 0x186   : > { %3848 = vmatprep.mubr.msk.bf16.mxu0 %vm1188_vm12, %v4844_v2  ;;  %v2376_v44 = vsel %vm4925_vm15, %v2374_v21, %v2375_v14  ;;  %v1989_v18 = vsel %vm4744_vm11, %v1984_v4, %v1988_v25  ;;  %v2129_v23 = vshll.u32 %v1591_v12, 16  ;;  %v2145_v9 = vshll.u32 %v1593_v3, 16 }
 0x187   : > { %3919 = vmatpush3.bf16.msra.mxu1 %v4250_v24  ;;  %v2348_v24 = vsel %vm4925_vm15, %v2346_v46, %v2347_v37  ;;  %v2559_v37 = vrot.slane %v4909_v30, 5  ;;  %v1592_v30 = vld [vmem:[#allocation2 + $0x70] sm:$0xf]  ;;  %v3407_v62 = vcombine.low %v1979_v31, %v1989_v18 }
 0x188   : > { %3936 = vmatprep.subr.bf16.mxu1 %v4964_v26  ;;  %v5001_v6 = vcombine.low %v2345_v36, %v2348_v24  ;;  %v5036_v36 = vcombine.low %v2373_v1, %v2376_v44  ;;  %v2704_v59 = vrot.slane %v1592_v30, 5  ;;  %v2135_v55 = vshll.u32 %v1592_v30, 16 }
 0x189   : > { %v2560_v46 = vsel %vm4925_vm15, %v3455_v28, %v2559_v37  ;;  %v2561_v48 = vrot.slane %v2559_v37, 4  ;;  %v2139_v27 = vshrl.u32 %v1592_v30, 16  ;;  %v2147_v11 = vrot.slane %v2145_v9, 5  ;;  %v5189_v37 = vld [vmem:[%s5325_s5] ss:$0 sm:$0xff] }
 0x18a   : > { %3905 = vmatmul.mubr.msk.bf16.gmra.mrb[4].mxu1 %vm1188_vm12, %v4852_v15  ;;  %v2706_v35 = vrot.slane %v2704_v59, 4  ;;  %v5060_v52 = vsel %vm4925_vm15, %v3467_v50, %v2704_v59  ;;  %v2137_v40 = vrot.slane %v2135_v55, 5 }
 0x18b   : > { %3908 = vmatprep.mubr.msk.bf16.mxu1 %vm1188_vm12, %v4871_v45  ;;  %v2563_v51 = vsel %vm4925_vm15, %v2561_v48, %v2562_v38 }
 0x18c   : > { %v5054_v24 = vcombine.low %v2560_v46, %v2563_v51  ;;  %v5064_v63 = vsel %vm4925_vm15, %v2706_v35, %v2707_v43 }
 0x18d   : > { %3849 = vmatmul.mubr.msk.bf16.gmra.mrb[28].mxu0 %vm1188_vm12, %v4858_v22  ;;  %v3468_v57 = vcombine.low %v5060_v52, %v5064_v63 }
 0x18e   : > { %3852 = vmatprep.mubr.msk.bf16.mxu0 %vm1188_vm12, %v4873_v39 }
 0x192   : > { %3909 = vmatmul.mubr.msk.bf16.gmra.mrb[8].mxu1 %vm1188_vm12, %v4884_v0 }
 0x193   : > { %3912 = vmatprep.mubr.msk.bf16.mxu1 %vm1188_vm12, %v4907_v29 }
 0x195   : > { %3853 = vmatmul.mubr.msk.bf16.gmra.mrb[32].mxu0 %vm1188_vm12, %v4876_v58 }
 0x196   : > { %3860 = vmatprep.mubr.msk.bf16.mxu0 %vm1188_vm12, %v4803_v17  ;;  %v4260_v17 = vld [vmem:[%s5324_s4 + $0x50] sm:$0xff]  }
 0x19a   : > { %3913 = vmatmul.mubr.msk.bf16.gmra.mrb[12].mxu1 %vm1188_vm12, %v3407_v62 }
 0x19b   : > { %3920 = vmatprep.mubr.msk.bf16.mxu1 %vm1188_vm12, %v4805_v61  ;;  %v2126_v61 = vshrl.u32 %v1591_v12, 16 }
 0x19d   : > { %3861 = vmatmul.mubr.msk.bf16.vlgmr.msra.gmra.mrb[20].mxu0 %vm1188_vm12, %v4826_v41 }
 0x19e   : > { %3864 = vmatprep.mubr.msk.bf16.mxu0 %vm1188_vm12, %v4844_v2 }
 0x1a2   : > { %3921 = vmatmul.mubr.msk.bf16.vlgmr.msra.gmra.mrb[0].mxu1 %vm1188_vm12, %v4835_v49  ;;  %v2128_v49 = vrot.slane %v2126_v61, 4 }
 0x1a3   : > { %3937 = vmatpush3.bf16.msra.mxu1 %v4964_v26  ;;  %3924 = vmatprep.mubr.msk.bf16.mxu1 %vm1188_vm12, %v4852_v15  ;;  %v2131_v26 = vrot.slane %v2129_v23, 5  ;;  %v2141_v15 = vrot.slane %v2139_v27, 4 }
 0x1a4   : > { %3938 = vmatprep.subr.bf16.mxu1 %v4257_v53 }
 0x1a5   : > { %v2132_v41 = vor.u32 %v2131_v26, %v2128_v49  ;;  %v2142_v8 = vor.u32 %v2141_v15, %v2137_v40  ;;  %3865 = vmatmul.mubr.msk.bf16.gmra.mrb[24].mxu0 %vm1188_vm12, %v4858_v22 }
 0x1a6   : > { %3868 = vmatprep.mubr.msk.bf16.mxu0 %vm1188_vm12, %v4873_v39  ;;  %v4262_v39 = vld [vmem:[#allocation2 + $0x6c] sm:$0xff]  }
 0x1a7   : > { %3939 = vmatpush3.bf16.msra.mxu1 %v4257_v53  ;;  %v2133_v2 = vrot.slane %v2132_v41, 4  ;;  %v2143_v10 = vrot.slane %v2142_v8, 4 }
 0x1a8   : > { %3956 = vmatprep.subr.bf16.mxu1 %v4260_v17 }
 0x1aa   : > { %3925 = vmatmul.mubr.msk.bf16.gmra.mrb[4].mxu1 %vm1188_vm12, %v4871_v45  ;;  %v2138_v45 = vsel %vm4744_vm11, %v2133_v2, %v2137_v40 }
 0x1ab   : > { %3928 = vmatprep.mubr.msk.bf16.mxu1 %vm1188_vm12, %v4884_v0  ;;  %v2148_v0 = vsel %vm4744_vm11, %v2143_v10, %v2147_v11 }
 0x1ac   : > { %v3418_v22 = vcombine.low %v2138_v45, %v2148_v0 }
 0x1ad   : > { %3869 = vmatmul.mubr.msk.bf16.gmra.mrb[28].mxu0 %vm1188_vm12, %v4876_v58  ;;  %v4263_v58 = vld [vmem:[%s5324_s4 + $0x80] sm:$0xff]  }
 0x1ae   : > { %3872 = vmatprep.mubr.msk.bf16.mxu0 %vm1188_vm12, %v4904_v19  ;;  %v4264_v19 = vld [vmem:[%s5324_s4 + $0x88] sm:$0xff]  }
 0x1b2   : > { %3929 = vmatmul.mubr.msk.bf16.gmra.mrb[8].mxu1 %vm1188_vm12, %v4907_v29  ;;  %v4265_v29 = vld [vmem:[%s5326_s6] sm:$0xff]  }
 0x1b3   : > { %3932 = vmatprep.mubr.msk.bf16.mxu1 %vm1188_vm12, %v3407_v62  ;;  %3996 = vmatprep.subr.bf16.mxu0 %v4265_v29 }
 0x1b4   : > { %3997 = vmatpush3.bf16.msra.mxu0 %v4265_v29 }
 0x1b5   : > { %3873 = vmatmul.mubr.msk.bf16.gmra.mrb[32].mxu0 %vm1188_vm12, %v4262_v39  ;;  %3998 = vmatprep.subr.bf16.mxu0 %v4266_v5 }
 0x1b8   : > { %3999 = vmatpush3.bf16.msra.mxu0 %v4266_v5 }
 0x1ba   : > { %3933 = vmatmul.mubr.msk.bf16.gmra.mrb[12].mxu1 %vm1188_vm12, %v3418_v22 }
 0x1bb   : > { %3940 = vmatprep.mubr.msk.bf16.mxu1 %vm1188_vm12, %v3437_v33 }
 0x1c2   : > { %3941 = vmatmul.mubr.msk.bf16.vlgmr.msra.gmra.mrb[0].mxu1 %vm1188_vm12, %v4975_v47 }
 0x1c3   : > { %3957 = vmatpush3.bf16.msra.mxu1 %v4260_v17  ;;  %3944 = vmatprep.mubr.msk.bf16.mxu1 %vm1188_vm12, %v4987_v42 }
 0x1c4   : > { %3958 = vmatprep.subr.bf16.mxu1 %v4261_v7 }
 0x1c7   : > { %3959 = vmatpush3.bf16.msra.mxu1 %v4261_v7 }
 0x1c8   : > { %3976 = vmatprep.subr.bf16.mxu1 %v4263_v58 }
 0x1ca   : > { %3945 = vmatmul.mubr.msk.bf16.gmra.mrb[4].mxu1 %vm1188_vm12, %v5001_v6 }
 0x1cb   : > { %3948 = vmatprep.mubr.msk.bf16.mxu1 %vm1188_vm12, %v5020_v60 }
 0x1d2   : > { %3949 = vmatmul.mubr.msk.bf16.gmra.mrb[8].mxu1 %vm1188_vm12, %v5026_v32 }
 0x1d3   : > { %3952 = vmatprep.mubr.msk.bf16.mxu1 %vm1188_vm12, %v5028_v34 }
 0x1da   : > { %3953 = vmatmul.mubr.msk.bf16.gmra.mrb[12].mxu1 %vm1188_vm12, %v5036_v36 }
 0x1db   : > { %3960 = vmatprep.mubr.msk.bf16.mxu1 %vm1188_vm12, %v4975_v47 }
 0x1e2   : > { %3961 = vmatmul.mubr.msk.bf16.vlgmr.msra.gmra.mrb[0].mxu1 %vm1188_vm12, %v4987_v42 }
 0x1e3   : > { %3977 = vmatpush3.bf16.msra.mxu1 %v4263_v58  ;;  %3964 = vmatprep.mubr.msk.bf16.mxu1 %vm1188_vm12, %v5001_v6 }
 0x1e4   : > { %3978 = vmatprep.subr.bf16.mxu1 %v4264_v19 }
 0x1e7   : > { %3979 = vmatpush3.bf16.msra.mxu1 %v4264_v19 }
 0x1ea   : > { %3965 = vmatmul.mubr.msk.bf16.gmra.mrb[4].mxu1 %vm1188_vm12, %v5020_v60 }
 0x1eb   : > { %3968 = vmatprep.mubr.msk.bf16.mxu1 %vm1188_vm12, %v5026_v32 }
 0x1f2   : > { %3969 = vmatmul.mubr.msk.bf16.gmra.mrb[8].mxu1 %vm1188_vm12, %v5028_v34 }
 0x1f3   : > { %3972 = vmatprep.mubr.msk.bf16.mxu1 %vm1188_vm12, %v5036_v36 }
 0x1fa   : > { %3973 = vmatmul.mubr.msk.bf16.gmra.mrb[12].mxu1 %vm1188_vm12, %v5054_v24 }
 0x1fb   : > { %3980 = vmatprep.mubr.msk.bf16.mxu1 %vm1188_vm12, %v4987_v42 }
 0x202   : > { %3981 = vmatmul.mubr.msk.bf16.vlgmr.msra.gmra.mrb[0].mxu1 %vm1188_vm12, %v5001_v6 }
 0x203   : > { %3984 = vmatprep.mubr.msk.bf16.mxu1 %vm1188_vm12, %v5020_v60 }
 0x20a   : > { %3985 = vmatmul.mubr.msk.bf16.gmra.mrb[4].mxu1 %vm1188_vm12, %v5026_v32 }
 0x20b   : > { %3988 = vmatprep.mubr.msk.bf16.mxu1 %vm1188_vm12, %v5028_v34 }
 0x212   : > { %3989 = vmatmul.mubr.msk.bf16.gmra.mrb[8].mxu1 %vm1188_vm12, %v5036_v36 }
 0x213   : > { %3992 = vmatprep.mubr.msk.bf16.mxu1 %vm1188_vm12, %v5054_v24 }
 0x21a   : > { %3993 = vmatmul.mubr.msk.bf16.gmra.mrb[12].mxu1 %vm1188_vm12, %v3468_v57 }
 0x270   : > { %v3862_v20 = vpop.f32.mrb[20].mxu0 }
 0x271   : > { %v1485_v33 = vpop.f32.mrb[21].mxu0 }
 0x272   : > { %v3863_v47 = vpop.f32.mrb[22].mxu0 }
 0x273   : > { %v1488_v42 = vpop.f32.mrb[23].mxu0 }
 0x278   : > { %v3866_v6 = vpop.f32.mrb[24].mxu0 }
 0x279   : > { %v1501_v13 = vpop.f32.mrb[25].mxu0 }
 0x27a   : > { %v3867_v14 = vpop.f32.mrb[26].mxu0 }
 0x27b   : > { %v1504_v60 = vpop.f32.mrb[27].mxu0 }
 0x280   : > { %v3870_v16 = vpop.f32.mrb[28].mxu0 }
 0x281   : > { %v1517_v56 = vpop.f32.mrb[29].mxu0 }
 0x282   : > { %v3871_v28 = vpop.f32.mrb[30].mxu0 }
 0x283   : > { %v1520_v32 = vpop.f32.mrb[31].mxu0 }
 0x288   : > { %v5178_v34 = vpop.f32.mrb[32].mxu0 }
 0x289   : > { %v5180_v1 = vpop.f32.mrb[33].mxu0 }
 0x28a   : > { %v5182_v21 = vpop.f32.mrb[34].mxu0 }
 0x28b   : > { %v5184_v4 = vpop.f32.mrb[35].mxu0 }
 0x2d5   : > { %v3982_v25 = vpop.f32.mrb[0].mxu1 }
 0x2d6   : > { %v4016_v38 = vadd.f32 %v3982_v25, %v3862_v20  ;;  %v2765_v44 = vpop.f32.mrb[1].mxu1 }
 0x2d7   : > { %v4017_v36 = vadd.f32 %v2765_v44, %v1485_v33  ;;  %v3983_v46 = vpop.f32.mrb[2].mxu1 }
 0x2d8   : > { %v2853_v48 = vadd.f32 %v4016_v38, %v5189_v37  ;;  %v4018_v31 = vadd.f32 %v3983_v46, %v3863_v47  ;;  %v2768_v30 = vpop.f32.mrb[3].mxu1 }
 0x2d9   : > { %v2851_v3 = vadd.f32 %v4017_v36, %v5189_v37  ;;  %v4019_v18 = vadd.f32 %v2768_v30, %v1488_v42 }
 0x2da   : > { %v2854_v51 = vadd.f32 %v4018_v31, %v5189_v37  ;;  %v2869_v59 = vmax.f32 %v2853_v48, 0.0 }
 0x2db   : > { %v2852_v54 = vadd.f32 %v4019_v18, %v5189_v37  ;;  %v2867_v24 = vmax.f32 %v2851_v3, 0.0 }
 0x2dc   : > { %v2870_v43 = vmax.f32 %v2854_v51, 0.0  ;;  %v3624_v51 = vld [vmem:[%s4512_s19 + $0x8] sm:$0xff]  }
 0x2dd   : > { %v2868_v50 = vmax.f32 %v2852_v54, 0.0  ;;  %v3986_v35 = vpop.f32.mrb[4].mxu1  ;;  %v5224_v54 = vld [vmem:[%s5327_s7] ss:$0 sm:$0xff] }
 0x2de   : > { %v2884_v62 = vpack.c.bf16 %v2870_v43, %v2869_v59  ;;  %v4020_v52 = vadd.f32 %v3986_v35, %v3866_v6  ;;  %v2781_v63 = vpop.f32.mrb[5].mxu1  ;;  %v3558_v59 = vunpack.c.l.bf16 %v3624_v51  ;;  %v3559_v35 = vunpack.c.h.bf16 %v3624_v51 }
 0x2df   : > { %v2883_v57 = vpack.c.bf16 %v2868_v50, %v2867_v24  ;;  %v4021_v53 = vadd.f32 %v2781_v63, %v1501_v13  ;;  %v3987_v12 = vpop.f32.mrb[6].mxu1 }
 0x2e0   : > { %v2857_v61 = vadd.f32 %v4020_v52, %v5189_v37  ;;  %v4022_v23 = vadd.f32 %v3987_v12, %v3867_v14  ;;  %v2784_v55 = vpop.f32.mrb[7].mxu1 }
 0x2e1   : > { %v2855_v27 = vadd.f32 %v4021_v53, %v5189_v37  ;;  %v4023_v17 = vadd.f32 %v2784_v55, %v1504_v60  ;;  %4000 = vmatprep.mubr.msk.bf16.mxu0 %vm1188_vm12, %v2883_v57  ;;  %v3626_v55 = vld [vmem:[%s4512_s19 + $0x18] sm:$0xff]  }
 0x2e2   : > { %v2858_v49 = vadd.f32 %v4022_v23, %v5189_v37  ;;  %4001 = vmatmul.mubr.msk.bf16.vlgmr.msra.gmra.mrb[36].mxu0 %vm1188_vm12, %v2884_v62  ;;  %v2873_v40 = vmax.f32 %v2857_v61, 0.0 }
 0x2e3   : > { %v2856_v26 = vadd.f32 %v4023_v17, %v5189_v37  ;;  %v2871_v41 = vmax.f32 %v2855_v27, 0.0  ;;  %v3625_v17 = vld [vmem:[%s4512_s19 + $0x10] sm:$0xff]  }
 0x2e4   : > { %v2874_v15 = vmax.f32 %v2858_v49, 0.0 }
 0x2e5   : > { %v2872_v8 = vmax.f32 %v2856_v26, 0.0  ;;  %v3990_v9 = vpop.f32.mrb[8].mxu1 }
 0x2e6   : > { %v2886_v2 = vpack.c.bf16 %v2874_v15, %v2873_v40  ;;  %v4024_v10 = vadd.f32 %v3990_v9, %v3870_v16  ;;  %v2797_v11 = vpop.f32.mrb[9].mxu1  ;;  %v3566_v15 = vunpack.c.l.bf16 %v3626_v55 }
 0x2e7   : > { %v2885_v45 = vpack.c.bf16 %v2872_v8, %v2871_v41  ;;  %v4025_v0 = vadd.f32 %v2797_v11, %v1517_v56  ;;  %v3991_v22 = vpop.f32.mrb[10].mxu1 }
 0x2e8   : > { %v2861_v39 = vadd.f32 %v4024_v10, %v5189_v37  ;;  %v4026_v7 = vadd.f32 %v3991_v22, %v3871_v28  ;;  %v2800_v58 = vpop.f32.mrb[11].mxu1 }
 0x2e9   : > { %v2859_v19 = vadd.f32 %v4025_v0, %v5189_v37  ;;  %v4027_v29 = vadd.f32 %v2800_v58, %v1520_v32  ;;  %4004 = vmatprep.mubr.msk.bf16.mxu0 %vm1188_vm12, %v2885_v45  ;;  %v3567_v0 = vunpack.c.h.bf16 %v3626_v55  ;;  %v3563_v58 = vunpack.c.h.bf16 %v3625_v17 }
 0x2ea   : > { %v2862_v5 = vadd.f32 %v4026_v7, %v5189_v37  ;;  %4005 = vmatmul.mubr.msk.bf16.gmra.mrb[40].mxu0 %vm1188_vm12, %v2886_v2  ;;  %v2877_v33 = vmax.f32 %v2861_v39, 0.0  ;;  %v3562_v2 = vunpack.c.l.bf16 %v3625_v17 }
 0x2eb   : > { %v2860_v20 = vadd.f32 %v4027_v29, %v5189_v37  ;;  %v2875_v42 = vmax.f32 %v2859_v19, 0.0 }
 0x2ec   : > { %v2878_v47 = vmax.f32 %v2862_v5, 0.0 }
 0x2ed   : > { %v2876_v6 = vmax.f32 %v2860_v20, 0.0  ;;  %v3994_v13 = vpop.f32.mrb[12].mxu1 }
 0x2ee   : > { %v2888_v14 = vpack.c.bf16 %v2878_v47, %v2877_v33  ;;  %v4028_v60 = vadd.f32 %v3994_v13, %v5178_v34  ;;  %v2813_v16 = vpop.f32.mrb[13].mxu1  ;;  %v3628_v47 = vld [vmem:[%s4512_s19 + $0x28] sm:$0xff]  }
 0x2ef   : > { %v2887_v56 = vpack.c.bf16 %v2876_v6, %v2875_v42  ;;  %v4029_v28 = vadd.f32 %v2813_v16, %v5180_v1  ;;  %v3995_v32 = vpop.f32.mrb[14].mxu1  ;;  %v3627_v6 = vld [vmem:[%s4512_s19 + $0x20] sm:$0xff]   ;;  %v3574_v16 = vunpack.c.l.bf16 %v3628_v47 }
 0x2f0   : > { %v2865_v25 = vadd.f32 %v4028_v60, %v5189_v37  ;;  %v4030_v38 = vadd.f32 %v3995_v32, %v5182_v21  ;;  %v2816_v44 = vpop.f32.mrb[15].mxu1 }
 0x2f1   : > { %v2863_v36 = vadd.f32 %v4029_v28, %v5189_v37  ;;  %v4031_v46 = vadd.f32 %v2816_v44, %v5184_v4  ;;  %4008 = vmatprep.mubr.msk.bf16.mxu0 %vm1188_vm12, %v2887_v56  ;;  %v3553_v4 = vld [vmem:[%s4512_s19] sm:$0xff]  }
 0x2f2   : > { %v2866_v34 = vadd.f32 %v4030_v38, %v5189_v37  ;;  %4009 = vmatmul.mubr.msk.bf16.gmra.mrb[44].mxu0 %vm1188_vm12, %v2888_v14  ;;  %v2881_v48 = vmax.f32 %v2865_v25, 0.0  ;;  %v3554_v43 = vunpack.c.l.bf16 %v3553_v4  ;;  %v3555_v63 = vunpack.c.h.bf16 %v3553_v4  ;;  %v3630_v4 = vld [vmem:[%s4512_s19 + $0x38] sm:$0xff]  }
 0x2f3   : > { %v2864_v1 = vadd.f32 %v4031_v46, %v5189_v37  ;;  %v2879_v30 = vmax.f32 %v2863_v36, 0.0  ;;  %v3570_v25 = vunpack.c.l.bf16 %v3627_v6  ;;  %v3575_v46 = vunpack.c.h.bf16 %v3628_v47 }
 0x2f4   : > { %v2882_v31 = vmax.f32 %v2866_v34, 0.0 }
 0x2f5   : > { %v2880_v3 = vmax.f32 %v2864_v1, 0.0 }
 0x2f6   : > { %v2890_v21 = vpack.c.bf16 %v2882_v31, %v2881_v48  ;;  %v3571_v31 = vunpack.c.h.bf16 %v3627_v6 }
 0x2f7   : > { %v2889_v18 = vpack.c.bf16 %v2880_v3, %v2879_v30 }
 0x2f9   : > { %4012 = vmatprep.mubr.msk.bf16.mxu0 %vm1188_vm12, %v2889_v18 }
 0x2fa   : > { %4013 = vmatmul.mubr.msk.bf16.gmra.mrb[48].mxu0 %vm1188_vm12, %v2890_v21 }
 0x3b5   : > { %v4002_v37 = vpop.f32.mrb[36].mxu0 }
 0x3b6   : > { %v2981_v24 = vadd.f32 %v4002_v37, %v5224_v54  ;;  %v2972_v50 = vpop.f32.mrb[37].mxu0  ;;  %v3629_v37 = vld [vmem:[%s4512_s19 + $0x30] sm:$0xff]   ;;  %s3193_s19 = sadd.s32 %s3551_s16, %s3510_s11 }
 0x3b7   : > { %v2973_v62 = vadd.f32 %v5224_v54, %v2972_v50  ;;  %v4003_v52 = vpop.f32.mrb[38].mxu0  ;;  %s3511_s30 = sshll.u32 %s3193_s19, 6 }
 0x3b8   : > { %v3069_v57 = vadd.f32 %v3558_v59, %v2981_v24  ;;  %v2984_v53 = vadd.f32 %v4003_v52, %v5224_v54  ;;  %v2975_v12 = vpop.f32.mrb[39].mxu0  ;;  %s5260_s25 = scalar_lea.hbm %s5328_s8, %s3511_s30 }
 0x3b9   : > { %v3067_v61 = vadd.f32 %v3554_v43, %v2973_v62  ;;  %v2976_v23 = vadd.f32 %v5224_v54, %v2975_v12 }
 0x3ba   : > { %v3070_v27 = vadd.f32 %v3559_v35, %v2984_v53  ;;  %v3085_v26 = vmax.f32 %v3069_v57, 0.0  ;;  %v3582_v35 = vunpack.c.l.bf16 %v3630_v4  ;;  %v3578_v57 = vunpack.c.l.bf16 %v3629_v37 }
 0x3bb   : > { %v3068_v49 = vadd.f32 %v3555_v63, %v2976_v23  ;;  %v3083_v41 = vmax.f32 %v3067_v61, 0.0  ;;  %v3583_v23 = vunpack.c.h.bf16 %v3630_v4 }
 0x3bc   : > { %v3086_v40 = vmax.f32 %v3070_v27, 0.0 }
 0x3bd   : > { %v3084_v8 = vmax.f32 %v3068_v49, 0.0  ;;  %v4006_v9 = vpop.f32.mrb[40].mxu0  ;;  %v3579_v49 = vunpack.c.h.bf16 %v3629_v37 }
 0x3be   : > { %v3592_v10 = vpack.c.bf16 %v3086_v40, %v3085_v26  ;;  %v2997_v11 = vadd.f32 %v4006_v9, %v5224_v54  ;;  %v2988_v45 = vpop.f32.mrb[41].mxu0 }
 0x3bf   : > { %v3587_v22 = vpack.c.bf16 %v3084_v8, %v3083_v41  ;;  %v2989_v39 = vadd.f32 %v5224_v54, %v2988_v45  ;;  %v4007_v7 = vpop.f32.mrb[42].mxu0 }
 0x3c0   : > { %3631 = vst [vmem:[%s4710_s21 + $0x8] sm:$0xff] %v3592_v10   ;;  %v3073_v19 = vadd.f32 %v3566_v15, %v2997_v11  ;;  %v3000_v29 = vadd.f32 %v4007_v7, %v5224_v54  ;;  %v2991_v5 = vpop.f32.mrb[43].mxu0 }
 0x3c1   : > { %3588 = vst [vmem:[%s4710_s21] sm:$0xff] %v3587_v22   ;;  %v3071_v20 = vadd.f32 %v3562_v2, %v2989_v39  ;;  %v2992_v33 = vadd.f32 %v5224_v54, %v2991_v5 }
 0x3c2   : > { %v3074_v42 = vadd.f32 %v3567_v0, %v3000_v29  ;;  %v3089_v14 = vmax.f32 %v3073_v19, 0.0 }
 0x3c3   : > { %v3072_v13 = vadd.f32 %v3563_v58, %v2992_v33  ;;  %v3087_v56 = vmax.f32 %v3071_v20, 0.0 }
 0x3c4   : > { %v3090_v60 = vmax.f32 %v3074_v42, 0.0 }
 0x3c5   : > { %v3088_v28 = vmax.f32 %v3072_v13, 0.0  ;;  %v4010_v32 = vpop.f32.mrb[44].mxu0 }
 0x3c6   : > { %v3602_v38 = vpack.c.bf16 %v3090_v60, %v3089_v14  ;;  %v3013_v44 = vadd.f32 %v4010_v32, %v5224_v54  ;;  %v3004_v36 = vpop.f32.mrb[45].mxu0 }
 0x3c7   : > { %v3597_v34 = vpack.c.bf16 %v3088_v28, %v3087_v56  ;;  %v3005_v1 = vadd.f32 %v5224_v54, %v3004_v36  ;;  %v4011_v48 = vpop.f32.mrb[46].mxu0 }
 0x3c8   : > { %3633 = vst [vmem:[%s4710_s21 + $0x18] sm:$0xff] %v3602_v38   ;;  %v3077_v30 = vadd.f32 %v3574_v16, %v3013_v44  ;;  %v3016_v3 = vadd.f32 %v4011_v48, %v5224_v54  ;;  %v3007_v21 = vpop.f32.mrb[47].mxu0 }
 0x3c9   : > { %3632 = vst [vmem:[%s4710_s21 + $0x10] sm:$0xff] %v3597_v34   ;;  %v3075_v18 = vadd.f32 %v3570_v25, %v3005_v1  ;;  %v3008_v51 = vadd.f32 %v5224_v54, %v3007_v21 }
 0x3ca   : > { %v3078_v59 = vadd.f32 %v3575_v46, %v3016_v3  ;;  %v3093_v24 = vmax.f32 %v3077_v30, 0.0 }
 0x3cb   : > { %v3076_v43 = vadd.f32 %v3571_v31, %v3008_v51  ;;  %v3091_v62 = vmax.f32 %v3075_v18, 0.0 }
 0x3cc   : > { %v3094_v50 = vmax.f32 %v3078_v59, 0.0 }
 0x3cd   : > { %v3092_v52 = vmax.f32 %v3076_v43, 0.0  ;;  %v4014_v63 = vpop.f32.mrb[48].mxu0 }
 0x3ce   : > { %v3612_v53 = vpack.c.bf16 %v3094_v50, %v3093_v24  ;;  %v3029_v12 = vadd.f32 %v4014_v63, %v5224_v54  ;;  %v3020_v61 = vpop.f32.mrb[49].mxu0 }
 0x3cf   : > { %v3607_v55 = vpack.c.bf16 %v3092_v52, %v3091_v62  ;;  %v3021_v27 = vadd.f32 %v5224_v54, %v3020_v61  ;;  %v4015_v17 = vpop.f32.mrb[50].mxu0 }
 0x3d0   : > { %3635 = vst [vmem:[%s4710_s21 + $0x28] sm:$0xff] %v3612_v53   ;;  %v3081_v26 = vadd.f32 %v3582_v35, %v3029_v12  ;;  %v3032_v40 = vadd.f32 %v4015_v17, %v5224_v54  ;;  %v3023_v15 = vpop.f32.mrb[51].mxu0 }
 0x3d1   : > { %3634 = vst [vmem:[%s4710_s21 + $0x20] sm:$0xff] %v3607_v55   ;;  %v3079_v41 = vadd.f32 %v3578_v57, %v3021_v27  ;;  %v3024_v8 = vadd.f32 %v5224_v54, %v3023_v15 }
 0x3d2   : > { %v3082_v9 = vadd.f32 %v3583_v23, %v3032_v40  ;;  %v3097_v10 = vmax.f32 %v3081_v26, 0.0 }
 0x3d3   : > { %v3080_v2 = vadd.f32 %v3579_v49, %v3024_v8  ;;  %v3095_v45 = vmax.f32 %v3079_v41, 0.0 }
 0x3d4   : > { %v3098_v11 = vmax.f32 %v3082_v9, 0.0 }
 0x3d5   : > { %v3096_v0 = vmax.f32 %v3080_v2, 0.0 }
 0x3d6   : > { %v3622_v22 = vpack.c.bf16 %v3098_v11, %v3097_v10 }
 0x3d7   : > { %v3617_v54 = vpack.c.bf16 %v3096_v0, %v3095_v45 }
 0x3d8   : > { %3637 = vst [vmem:[%s4710_s21 + $0x38] sm:$0xff] %v3622_v22  }
 0x3d9   : > { %3636 = vst [vmem:[%s4710_s21 + $0x30] sm:$0xff] %v3617_v54  }
 0x3da   : > { %4280 = shalt.err (!%p4277_p11)
}
 0x3db   : > { %s4281_s21 = scalar_lea.hbm %s5260_s25, 1024  ;;  %s4285_s22 = scalar_lea.hbm %s5328_s8, 4096 }
 0x3dc   : > { %p4282_p12 = scmp.ne.s32.totalorder %s5260_s25, %s4281_s21  ;;  %p4286_p1 = scmp.lt.u32.totalorder %s5260_s25, %s5328_s8 }
 0x3dd   : > { %p4287_p2 = scmp.lt.u32.totalorder %s4285_s22, %s4281_s21  ;;  %p4289_p5 = scmp.lt.u32.totalorder %s4281_s21, %s5260_s25 }
 0x3de   : > { %p4283_p13 = pnand %p4282_p12, %p4464_p3 }
 0x3df   : > { %p4288_p4 = por %p4287_p2, %p4286_p1 }
 0x3e0   : > { %p4284_p0 = pneg %p4283_p13 }
 0x3e1   : > { %p4290_p6 = por %p4289_p5, %p4288_p4 }
 0x3e3   : > { %p4291_p7 = pnand %p4290_p6, %p4284_p0 }
 0x3e5   : > { %4294 = shalt.err (!%p4291_p7)
}
 0x3e6   : > { %s4366_s19 = smov 64   ;;  %s4367_s30 = smov 4  }
 0x3e7   : > { %4144 = dma.vmem_to_hbm [thread:$0]  (%p4464_p3), %s5262_s9, 1024, %s5260_s25, %s5268_s10, %s4366_s19, %s4366_s19, %s4367_s30  }
 0x3e8 PF: > { %p4150_p9 = scmp.ge.s32.totalorder %s4361_s12, 2  ;;  %s3211_s20 = sand.u32 1, %s4333_s27  }
 0x3e9   : > { %s3212_s29 = scalar_lea.sflag [#allocation4], %s3211_s20 }
 0x3ea   : > { %p4147_p10 = pnand %p4150_p9, %p4473_p8 }
 0x3ec   : > { %4328 = dma.done.wait (!%p4147_p10), %s3212_s29, 1024  }
 0x3ed   : > { %4330 = vsyncadd (!%p4147_p10), %s3212_s29, 4294966272  ;;  %s21_s12 = sadd.s32 1, %s4361_s12   ;;  %s5359_s23 = sld [smem:[#allocation6_spill]] }
 0x3ee   : > { %p18_p11 = scmp.ge.s32.totalorder %s21_s12, 6   ;;  %s5360_s29 = sld [smem:[#allocation12_spill]] }
 0x3ef   : > { %s5361_s30 = sld [smem:[#allocation7_spill]]  ;;  %s5362_s9 = sld [smem:[#allocation8_spill]] }
 0x3f0   : > { %s5363_s10 = sld [smem:[#allocation9_spill]]  ;;  %s5364_s11 = sld [smem:[#allocation10_spill]] }
 0x3f1   : > { %s5365_s27 = smov %s4337_s28  ;;  %20 = sbr.rel (!%p18_p11) target bundleno = 5 (0x5), region = 100 }
 0x3f3   : > { %s5366_s28 = smov %s5359_s23 }
 0x3f8   :  { %3217 = vsyncpa [#allocation4], 1 }
 0x3f9   :  { %3219 = vsyncpa [#allocation4 + $0x1], 1 }

</bundles_post_ra>
